<compile_context>
chip_gen: v5e
topology: v5e:2x2
jax: 0.10.0
libtpu: 0.0.40
codegen_flags: <defaults>
</compile_context>

<pallas_src>
import functools

import jax
import jax.numpy as jnp
from jax.experimental import pallas as pl
from jax.experimental.pallas import tpu as pltpu


def _round_up(x, m):
    return (x + m - 1) // m * m


def actor_kernel(x_ref, w1_ref, b1_ref, w2_ref, b2_ref, w3_ref, b3_ref, out_ref):
    # Cast activations to the (bf16) weight dtype so dots take the native bf16 MXU
    # path; accumulate in f32.
    x = x_ref[...].astype(w1_ref.dtype)

    # Layer 1: Linear + ReLU   (TB, S) @ (S, H) -> (TB, H)
    h1 = jnp.dot(x, w1_ref[...], preferred_element_type=jnp.float32)
    h1 = jnp.maximum(h1 + b1_ref[...], 0.0)

    # Layer 2: Linear + ReLU   (TB, H) @ (H, H) -> (TB, H)
    h2 = jnp.dot(h1.astype(w2_ref.dtype), w2_ref[...], preferred_element_type=jnp.float32)
    h2 = jnp.maximum(h2 + b2_ref[...], 0.0)

    # Layer 3: Linear          (TB, H) @ (H, A_pad) -> (TB, A_pad)
    # Padded action lanes carry a large negative bias so their softmax mass is 0.
    logits = jnp.dot(h2.astype(w3_ref.dtype), w3_ref[...], preferred_element_type=jnp.float32)
    logits = logits + b3_ref[...]

    # Numerically stable softmax over the lane-padded action axis.
    # Exact normalization (no approx reciprocal) so rows sum to 1 to f32 precision.
    m = jnp.max(logits, axis=-1, keepdims=True)
    e = jnp.exp(logits - m)
    denom = jnp.sum(e, axis=-1, keepdims=True)
    out_ref[...] = (e / denom).astype(out_ref.dtype)


def init_actor_params(key, state_dim, action_dim, hidden_size=576):
    """Deterministic PyTorch-style uniform(-1/sqrt(fan_in), 1/sqrt(fan_in)) init (f32)."""
    keys = jax.random.split(key, 6)

    def linear(kw, kb, fan_in, fan_out):
        bound = 1.0 / jnp.sqrt(jnp.float32(fan_in))
        w = jax.random.uniform(kw, (fan_in, fan_out), jnp.float32, -bound, bound)
        b = jax.random.uniform(kb, (1, fan_out), jnp.float32, -bound, bound)
        return w, b

    w1, b1 = linear(keys[0], keys[1], state_dim, hidden_size)
    w2, b2 = linear(keys[2], keys[3], hidden_size, hidden_size)
    w3, b3 = linear(keys[4], keys[5], hidden_size, action_dim)
    return {"w1": w1, "b1": b1, "w2": w2, "b2": b2, "w3": w3, "b3": b3}


def prepare_actor_params(params, weight_dtype=jnp.bfloat16, lane_pad=128, neg_fill=-1e9):
    """One-time prep: cast weights to bf16, keep biases f32, lane-pad the output layer.

    Padded action columns get zero weights and a large negative bias so their softmax
    probability is exactly 0; the wrapper slices them away.
    """
    H, A = params["w3"].shape
    a_pad = _round_up(max(A, lane_pad), lane_pad)

    w3 = jnp.zeros((H, a_pad), weight_dtype).at[:, :A].set(params["w3"].astype(weight_dtype))
    b3 = jnp.full((1, a_pad), neg_fill, jnp.float32).at[:, :A].set(
        params["b3"].astype(jnp.float32)
    )
    return {
        "w1": params["w1"].astype(weight_dtype),
        "b1": params["b1"].astype(jnp.float32),
        "w2": params["w2"].astype(weight_dtype),
        "b2": params["b2"].astype(jnp.float32),
        "w3": w3,
        "b3": b3,
    }


@functools.partial(jax.jit, static_argnames=("action_dim", "tile_b"))
def actor_forward(state, prep, *, action_dim, tile_b=256):
    """state: (B, state_dim) f32. prep: output of prepare_actor_params. Returns bf16 probs."""
    B, S = state.shape
    H = prep["w1"].shape[1]
    a_pad = prep["w3"].shape[1]

    # Batch tiling: a single big tile whenever it fits (per-grid-step overhead dominates
    # this ~1us kernel); otherwise tiles of `tile_b` rows (sublane-aligned).
    tb = min(tile_b, _round_up(B, 8))
    b_pad = _round_up(B, tb)
    if b_pad != B:
        state = jnp.pad(state, ((0, b_pad - B), (0, 0)))
    num_tiles = b_pad // tb

    # Megacore split only pays once several tiles amortize the duplicated weight DMA.
    semantics = ("parallel",) if num_tiles >= 4 else ("arbitrary",)

    weight_bytes = sum(
        prep[k].size * prep[k].dtype.itemsize for k in ("w1", "b1", "w2", "b2", "w3", "b3")
    )
    cost = pl.CostEstimate(
        flops=2 * b_pad * (S * H + H * H + H * a_pad),
        transcendentals=b_pad * a_pad,  # softmax exp
        bytes_accessed=weight_bytes
        + b_pad * S * state.dtype.itemsize
        + b_pad * a_pad * 2,  # bf16 output write-back
    )

    out = pl.pallas_call(
        actor_kernel,
        out_shape=jax.ShapeDtypeStruct((b_pad, a_pad), jnp.bfloat16),
        grid=(num_tiles,),
        in_specs=[
            pl.BlockSpec((tb, S), lambda i: (i, 0)),      # state: tiled over batch
            pl.BlockSpec((S, H), lambda i: (0, 0)),       # w1: VMEM-resident across steps
            pl.BlockSpec((1, H), lambda i: (0, 0)),       # b1
            pl.BlockSpec((H, H), lambda i: (0, 0)),       # w2
            pl.BlockSpec((1, H), lambda i: (0, 0)),       # b2
            pl.BlockSpec((H, a_pad), lambda i: (0, 0)),   # w3 (lane-padded)
            pl.BlockSpec((1, a_pad), lambda i: (0, 0)),   # b3 (lane-padded)
        ],
        out_specs=pl.BlockSpec((tb, a_pad), lambda i: (i, 0)),
        compiler_params=pltpu.CompilerParams(dimension_semantics=semantics),
        cost_estimate=cost,
    )(state, prep["w1"], prep["b1"], prep["w2"], prep["b2"], prep["w3"], prep["b3"])

    return out[:B, :action_dim]


def actor_reference(state, prep, action_dim):
    """Pure-JAX reference mirroring the kernel's numerics (bf16 weights, f32 accum/softmax)."""
    x = state.astype(prep["w1"].dtype)
    h1 = jnp.maximum(
        jnp.dot(x, prep["w1"], preferred_element_type=jnp.float32) + prep["b1"], 0.0
    )
    h2 = jnp.maximum(
        jnp.dot(h1.astype(prep["w2"].dtype), prep["w2"], preferred_element_type=jnp.float32)
        + prep["b2"],
        0.0,
    )
    logits = (
        jnp.dot(h2.astype(prep["w3"].dtype), prep["w3"], preferred_element_type=jnp.float32)
        + prep["b3"]
    )
    return jax.nn.softmax(logits, axis=-1)[:, :action_dim]


if __name__ == "__main__":
    key = jax.random.PRNGKey(0)
    k_state, k_params = jax.random.split(key)

    batch = 32           # fits one batch tile -> grid=(1,), no megacore split
    state_dim = 16
    action_dim = 4
    hidden_size = 576    # matches the PyTorch module default

    state = jax.random.normal(k_state, (batch, state_dim), dtype=jnp.float32)
    params = init_actor_params(k_params, state_dim, action_dim, hidden_size)
    prep = prepare_actor_params(params)

    probs = actor_forward(state, prep, action_dim=action_dim)
    probs = jax.block_until_ready(probs)

    probs_f32 = probs.astype(jnp.float32)
    ref = actor_reference(state, prep, action_dim)

    assert probs.shape == (batch, action_dim)
    # Output is bf16 (lane-dense slab): each prob carries <=~0.2% rounding, so row
    # sums match 1 and the f32 reference to ~5e-3.
    assert jnp.allclose(jnp.sum(probs_f32, axis=-1), 1.0, atol=5e-3), "softmax rows must sum to 1"
    assert jnp.allclose(probs_f32, ref, atol=5e-3, rtol=5e-3), "mismatch vs pure-JAX reference"

    print("KERNEL_OK")
</pallas_src>

<mosaic_0001>
module attributes {stable_mosaic.version = 11 : i64} {
  func.func @actor_kernel(%arg0: i32, %arg1: memref<32x16xf32, #tpu.memory_space<vmem>>, %arg2: memref<16x576xbf16, #tpu.memory_space<vmem>>, %arg3: memref<1x576xf32, #tpu.memory_space<vmem>>, %arg4: memref<576x576xbf16, #tpu.memory_space<vmem>>, %arg5: memref<1x576xf32, #tpu.memory_space<vmem>>, %arg6: memref<576x128xbf16, #tpu.memory_space<vmem>>, %arg7: memref<1x128xf32, #tpu.memory_space<vmem>>, %arg8: memref<32x128xbf16, #tpu.memory_space<vmem>>) attributes {dimension_semantics = [#tpu.dimension_semantics<arbitrary>], iteration_bounds = array<i64: 1>, scalar_prefetch = 0 : i64, scratch_operands = 0 : i64, tpu.core_type = #tpu.core_type<tc>, window_params = [{transform_indices = @transform_0, window_bounds = array<i64: 32, 16>}, {pipeline_mode = #tpu.pipeline_mode<synchronous>, transform_indices = @transform_1, window_bounds = array<i64: 16, 576>}, {pipeline_mode = #tpu.pipeline_mode<synchronous>, transform_indices = @transform_2, window_bounds = array<i64: 1, 576>}, {pipeline_mode = #tpu.pipeline_mode<synchronous>, transform_indices = @transform_3, window_bounds = array<i64: 576, 576>}, {pipeline_mode = #tpu.pipeline_mode<synchronous>, transform_indices = @transform_4, window_bounds = array<i64: 1, 576>}, {pipeline_mode = #tpu.pipeline_mode<synchronous>, transform_indices = @transform_5, window_bounds = array<i64: 576, 128>}, {pipeline_mode = #tpu.pipeline_mode<synchronous>, transform_indices = @transform_6, window_bounds = array<i64: 1, 128>}, {transform_indices = @transform_7, window_bounds = array<i64: 32, 128>}]} {
    %c0 = arith.constant 0 : index
    %c0_0 = arith.constant 0 : index
    %0 = vector.load %arg1[%c0, %c0_0] : memref<32x16xf32, #tpu.memory_space<vmem>>, vector<32x16xf32>
    %1 = arith.truncf %0 : vector<32x16xf32> to vector<32x16xbf16>
    %c0_1 = arith.constant 0 : index
    %c0_2 = arith.constant 0 : index
    %2 = vector.load %arg2[%c0_1, %c0_2] : memref<16x576xbf16, #tpu.memory_space<vmem>>, vector<16x576xbf16>
    %cst = arith.constant dense<0.000000e+00> : vector<32x576xf32>
    %3 = tpu.matmul %1, %2, %cst {dimension_numbers = #tpu.dot_dimension_numbers<[1], [0], [0], [1], [0, 0, 1, 1], [], []>} : vector<32x16xbf16>, vector<16x576xbf16>, vector<32x576xf32> -> vector<32x576xf32>
    %c0_3 = arith.constant 0 : index
    %c0_4 = arith.constant 0 : index
    %4 = vector.load %arg3[%c0_3, %c0_4] : memref<1x576xf32, #tpu.memory_space<vmem>>, vector<1x576xf32>
    %5 = vector.broadcast %4 : vector<1x576xf32> to vector<32x576xf32>
    %6 = arith.addf %3, %5 : vector<32x576xf32>
    %cst_5 = arith.constant 0.000000e+00 : f32
    %7 = vector.broadcast %cst_5 : f32 to vector<32x576xf32>
    %8 = arith.maximumf %6, %7 : vector<32x576xf32>
    %9 = arith.truncf %8 : vector<32x576xf32> to vector<32x576xbf16>
    %c0_6 = arith.constant 0 : index
    %c0_7 = arith.constant 0 : index
    %10 = vector.load %arg4[%c0_6, %c0_7] : memref<576x576xbf16, #tpu.memory_space<vmem>>, vector<576x576xbf16>
    %cst_8 = arith.constant dense<0.000000e+00> : vector<32x576xf32>
    %11 = tpu.matmul %9, %10, %cst_8 {dimension_numbers = #tpu.dot_dimension_numbers<[1], [0], [0], [1], [0, 0, 1, 1], [], []>} : vector<32x576xbf16>, vector<576x576xbf16>, vector<32x576xf32> -> vector<32x576xf32>
    %c0_9 = arith.constant 0 : index
    %c0_10 = arith.constant 0 : index
    %12 = vector.load %arg5[%c0_9, %c0_10] : memref<1x576xf32, #tpu.memory_space<vmem>>, vector<1x576xf32>
    %13 = vector.broadcast %12 : vector<1x576xf32> to vector<32x576xf32>
    %14 = arith.addf %11, %13 : vector<32x576xf32>
    %cst_11 = arith.constant 0.000000e+00 : f32
    %15 = vector.broadcast %cst_11 : f32 to vector<32x576xf32>
    %16 = arith.maximumf %14, %15 : vector<32x576xf32>
    %17 = arith.truncf %16 : vector<32x576xf32> to vector<32x576xbf16>
    %c0_12 = arith.constant 0 : index
    %c0_13 = arith.constant 0 : index
    %18 = vector.load %arg6[%c0_12, %c0_13] : memref<576x128xbf16, #tpu.memory_space<vmem>>, vector<576x128xbf16>
    %cst_14 = arith.constant dense<0.000000e+00> : vector<32x128xf32>
    %19 = tpu.matmul %17, %18, %cst_14 {dimension_numbers = #tpu.dot_dimension_numbers<[1], [0], [0], [1], [0, 0, 1, 1], [], []>} : vector<32x576xbf16>, vector<576x128xbf16>, vector<32x128xf32> -> vector<32x128xf32>
    %c0_15 = arith.constant 0 : index
    %c0_16 = arith.constant 0 : index
    %20 = vector.load %arg7[%c0_15, %c0_16] : memref<1x128xf32, #tpu.memory_space<vmem>>, vector<1x128xf32>
    %21 = vector.broadcast %20 : vector<1x128xf32> to vector<32x128xf32>
    %22 = arith.addf %19, %21 : vector<32x128xf32>
    %cst_17 = arith.constant dense<0xFF800000> : vector<32xf32>
    %23 = vector.multi_reduction <maximumf>, %22, %cst_17 [1] : vector<32x128xf32> to vector<32xf32>
    %24 = vector.shape_cast %23 : vector<32xf32> to vector<32x1xf32>
    %25 = vector.broadcast %24 : vector<32x1xf32> to vector<32x128xf32>
    %26 = arith.subf %22, %25 : vector<32x128xf32>
    %27 = math.exp %26 : vector<32x128xf32>
    %cst_18 = arith.constant dense<0.000000e+00> : vector<32xf32>
    %28 = vector.multi_reduction <add>, %27, %cst_18 [1] : vector<32x128xf32> to vector<32xf32>
    %29 = vector.shape_cast %28 : vector<32xf32> to vector<32x1xf32>
    %30 = vector.broadcast %29 : vector<32x1xf32> to vector<32x128xf32>
    %31 = arith.divf %27, %30 : vector<32x128xf32>
    %32 = arith.truncf %31 : vector<32x128xf32> to vector<32x128xbf16>
    %c0_19 = arith.constant 0 : index
    %c0_20 = arith.constant 0 : index
    %33 = vector.load %arg8[%c0_19, %c0_20] : memref<32x128xbf16, #tpu.memory_space<vmem>>, vector<32x128xbf16>
    tpu.vector_store %arg8[%c0_19, %c0_20], %32 {strides = array<i32>} : memref<32x128xbf16, #tpu.memory_space<vmem>>, vector<32x128xbf16>,
    return
  }
  func.func @transform_0(%arg0: i32) -> (i32, i32) {
    %c0_i32 = arith.constant 0 : i32
    %c0_i32_0 = arith.constant 0 : i32
    return %arg0, %c0_i32 : i32, i32
  }
  func.func @transform_1(%arg0: i32) -> (i32, i32) {
    %c0_i32 = arith.constant 0 : i32
    %c0_i32_0 = arith.constant 0 : i32
    %c0_i32_1 = arith.constant 0 : i32
    return %c0_i32, %c0_i32_0 : i32, i32
  }
  func.func @transform_2(%arg0: i32) -> (i32, i32) {
    %c0_i32 = arith.constant 0 : i32
    %c0_i32_0 = arith.constant 0 : i32
    %c0_i32_1 = arith.constant 0 : i32
    return %c0_i32, %c0_i32_0 : i32, i32
  }
  func.func @transform_3(%arg0: i32) -> (i32, i32) {
    %c0_i32 = arith.constant 0 : i32
    %c0_i32_0 = arith.constant 0 : i32
    %c0_i32_1 = arith.constant 0 : i32
    return %c0_i32, %c0_i32_0 : i32, i32
  }
  func.func @transform_4(%arg0: i32) -> (i32, i32) {
    %c0_i32 = arith.constant 0 : i32
    %c0_i32_0 = arith.constant 0 : i32
    %c0_i32_1 = arith.constant 0 : i32
    return %c0_i32, %c0_i32_0 : i32, i32
  }
  func.func @transform_5(%arg0: i32) -> (i32, i32) {
    %c0_i32 = arith.constant 0 : i32
    %c0_i32_0 = arith.constant 0 : i32
    %c0_i32_1 = arith.constant 0 : i32
    return %c0_i32, %c0_i32_0 : i32, i32
  }
  func.func @transform_6(%arg0: i32) -> (i32, i32) {
    %c0_i32 = arith.constant 0 : i32
    %c0_i32_0 = arith.constant 0 : i32
    %c0_i32_1 = arith.constant 0 : i32
    return %c0_i32, %c0_i32_0 : i32, i32
  }
  func.func @transform_7(%arg0: i32) -> (i32, i32) {
    %c0_i32 = arith.constant 0 : i32
    %c0_i32_0 = arith.constant 0 : i32
    return %arg0, %c0_i32 : i32, i32
  }
}

</mosaic_0001>

<bundles_post_ra>
// kernel: actor_forward.1
= control target key start
LH: loop header
LB: loop body
LE: loop exit
PB: predicated region body
PF: predicated region fallthrough
CT: control target
= control target key end

     0   :  { %12 = vsyncpa [#allocation3], 0  ;;  %s3950_s0 = inlined_call_operand.vmem [shape: f32[32,16], index: 0, kind: input, shape index: {}]   ;;  %s3951_s1 = inlined_call_operand.vmem [shape: bf16[16,576], index: 1, kind: input, shape index: {}]   ;;  %s3952_s2 = inlined_call_operand.vmem [shape: f32[1,576], index: 2, kind: input, shape index: {}]   ;;  %s3953_s3 = inlined_call_operand.hbm [shape: bf16[576,576], index: 3, kind: input, shape index: {}]   ;;  %s3954_s4 = inlined_call_operand.vmem [shape: f32[1,576], index: 4, kind: input, shape index: {}]   ;;  %s3955_s5 = inlined_call_operand.hbm [shape: bf16[576,128], index: 5, kind: input, shape index: {}]   ;;  %s3956_s6 = inlined_call_operand.vmem [shape: f32[1,128], index: 6, kind: input, shape index: {}]   ;;  %s3957_s7 = inlined_call_operand.vmem [shape: bf16[32,128], index: 7, kind: output, shape index: {}]  }
   0x1   :  { %s24_s26 = sshll.u32 %s3953_s3, 4  ;;  %s25_s26 = int_to_ptr.hbm [resolvable:$true] %s24_s26 }
   0x2   :  { %13 = vsyncpa [#allocation5], 0  ;;  %s3626_s27 = smov [#allocation2]   ;;  %s39_s8 = sshll.u32 %s3955_s5, 4  ;;  %s40_s8 = int_to_ptr.hbm [resolvable:$true] %s39_s8 }
   0x3   :  { %s26_s28 = sshll.u32 %s3626_s27, 4  ;;  %s3627_s9 = smov 320   ;;  %s27_s28 = int_to_ptr.vmem [resolvable:$true] %s26_s28 }
   0x4   :  { %s3628_s10 = smov 20   ;;  %s3629_s11 = smov [#allocation4]  }
   0x5   :  { %32 = dma.hbm_to_vmem [thread:$0]  %s25_s26, 23040, %s27_s28, [#allocation3], %s3627_s9, %s3627_s9, %s3628_s10  }
   0x6   :  { %s41_s12 = sshll.u32 %s3629_s11, 4  ;;  %s3630_s13 = smov 64   ;;  %s42_s12 = int_to_ptr.vmem [resolvable:$true] %s41_s12 }
   0x7   :  { %s3631_s14 = smov 4  }
   0x8   :  { %47 = dma.hbm_to_vmem [thread:$0]  %s40_s8, 4608, %s42_s12, [#allocation5], %s3630_s13, %s3630_s13, %s3631_s14  }
   0x9   :  { %3622 = dma.done.wait [#allocation3], 23040  }
   0xa   :  { %3623 = vsyncadd [#allocation3], 4294944256 }
   0xb   :  { %3624 = dma.done.wait [#allocation5], 4608  }
   0xc   :  { %3625 = vsyncadd [#allocation5], 4294962688  ;;  %v2414_v0 = vld [vmem:[%s3951_s1] sm:$0xf]  ;;  %v3320_v1 = vld [vmem:[%s3951_s1 + $0x10] sm:$0xf0] }
   0xd   :  { %v3318_v2 = vld [vmem:[%s3951_s1 + $0x4] sm:$0xf]  ;;  %v2415_v3 = vor.u32 %v3320_v1, %v2414_v0  ;;  %v2416_v4 = vld [vmem:[%s3951_s1 + $0x14] sm:$0xf0]  ;;  %v2422_v5 = vld [vmem:[%s3951_s1 + $0x8] sm:$0xf] }
   0xe   :  { %v3321_v6 = vld [vmem:[%s3951_s1 + $0x18] sm:$0xf0]  ;;  %v2419_v7 = vor.u32 %v3318_v2, %v2416_v4  ;;  %v59_v9 = vld [vmem:[%s3950_s0] sm:$0xff]  ;;  %v60_v10 = vld [vmem:[%s3950_s0 + $0x8] sm:$0xff]  ;;  %vm109_vm0 = vcmask 130048   ;;  %vm1405_vm1 = vcmask 523264  }
   0xf   :  { %v2423_v8 = vor.u32 %v3321_v6, %v2422_v5  ;;  %v61_v11 = vld [vmem:[%s3950_s0 + $0x10] sm:$0xff]  ;;  %123 = vmatpush.bf16.msra.mxu0 %v2415_v3  ;;  %3550 = vmatpush.bf16.msra.mxu3 %v2415_v3  ;;  %v3705_v12 = vpack.c.bf16 %v60_v10, %v59_v9  ;;  %v62_v13 = vld [vmem:[%s3950_s0 + $0x18] sm:$0xff]  ;;  %v3319_v14 = vld [vmem:[%s3951_s1 + $0xc] sm:$0xf] }
  0x10   :  { %v2424_v15 = vld [vmem:[%s3951_s1 + $0x1c] sm:$0xf0]  ;;  %142 = vmatpush.bf16.msra.mxu1 %v2419_v7  ;;  %v3716_v16 = vpack.c.bf16 %v62_v13, %v61_v11  ;;  %v2430_v18 = vld [vmem:[%s3951_s1 + $0x10] sm:$0xf]  ;;  %v3322_v19 = vld [vmem:[%s3951_s1 + $0x20] sm:$0xf0] }
  0x11   :  { %161 = vmatpush.bf16.msra.mxu2 %v2423_v8  ;;  %v2427_v17 = vor.u32 %v3319_v14, %v2424_v15  ;;  %v2431_v20 = vor.u32 %v3322_v19, %v2430_v18  ;;  %v2584_v21 = vld [vmem:[#allocation2 + $0x118] sm:$0xf]  ;;  %v3360_v22 = vld [vmem:[#allocation2 + $0x128] sm:$0xf0]  ;;  %v2564_v26 = vld [vmem:[#allocation2 + $0xf0] sm:$0xf] }
  0x12   :  { %2432 = vmatmul.msk.bf16.vlgmr.msra.gmra.mxu0 %vm109_vm0, %v3705_v12  ;;  %2433 = vmatmul.msk.bf16.vlgmr.msra.gmra.mxu3 %vm109_vm0, %v3716_v16  ;;  %v2744_v23 = vld [vmem:[#allocation2 + $0x258] sm:$0xf]  ;;  %v2585_v24 = vor.u32 %v3360_v22, %v2584_v21  ;;  %v3400_v25 = vld [vmem:[#allocation2 + $0x268] sm:$0xf0]  ;;  %v3355_v27 = vld [vmem:[#allocation2 + $0x100] sm:$0xf0] }
  0x13   :  { %2434 = vmatmul.msk.bf16.vlgmr.msra.gmra.mxu1 %vm109_vm0, %v3705_v12  ;;  %180 = vmatpush.bf16.msrb.mxu3 %v2427_v17  ;;  %v2745_v28 = vor.u32 %v3400_v25, %v2744_v23  ;;  %v2724_v29 = vld [vmem:[#allocation2 + $0x230] sm:$0xf]  ;;  %v3395_v30 = vld [vmem:[#allocation2 + $0x240] sm:$0xf0]  ;;  %v2904_v31 = vld [vmem:[#allocation2 + $0x398] sm:$0xf]  ;;  %v2565_v32 = vor.u32 %v3355_v27, %v2564_v26 }
  0x14   :  { %2436 = vmatmul.msk.bf16.vlgmr.msra.gmra.mxu2 %vm109_vm0, %v3705_v12  ;;  %199 = vmatpush.bf16.msrb.mxu0 %v2431_v20  ;;  %v3440_v33 = vld [vmem:[#allocation2 + $0x3a8] sm:$0xf0]  ;;  %v2725_v34 = vor.u32 %v3395_v30, %v2724_v29  ;;  %v2544_v36 = vld [vmem:[#allocation2 + $0xc8] sm:$0xf]  ;;  %v3350_v37 = vld [vmem:[#allocation2 + $0xd8] sm:$0xf0] }
  0x15   :  { %1412 = vmatpush.bf16.msrb.mxu1 %v2585_v24  ;;  %1431 = vmatpush.bf16.msrb.mxu2 %v2745_v28  ;;  %v2905_v35 = vor.u32 %v3440_v33, %v2904_v31  ;;  %v2884_v38 = vld [vmem:[#allocation2 + $0x370] sm:$0xf]  ;;  %v2704_v39 = vld [vmem:[#allocation2 + $0x208] sm:$0xf]  ;;  %v3390_v40 = vld [vmem:[#allocation2 + $0x218] sm:$0xf0]  ;;  %v2545_v43 = vor.u32 %v3350_v37, %v2544_v36 }
  0x16   :  { %v3435_v41 = vld [vmem:[#allocation2 + $0x380] sm:$0xf0]  ;;  %v2864_v44 = vld [vmem:[#allocation2 + $0x348] sm:$0xf]  ;;  %v3430_v45 = vld [vmem:[#allocation2 + $0x358] sm:$0xf0]  ;;  %v2705_v46 = vor.u32 %v3390_v40, %v2704_v39 }
  0x17   :  { %1450 = vmatpush.bf16.msra.mxu3 %v2905_v35  ;;  %v2885_v42 = vor.u32 %v3435_v41, %v2884_v38  ;;  %v2524_v47 = vld [vmem:[#allocation2 + $0xa0] sm:$0xf]  ;;  %v3345_v48 = vld [vmem:[#allocation2 + $0xb0] sm:$0xf0]  ;;  %v2865_v49 = vor.u32 %v3430_v45, %v2864_v44  ;;  %v2504_v53 = vld [vmem:[#allocation2 + $0x78] sm:$0xf] }
  0x18   :  { %v2525_v50 = vor.u32 %v3345_v48, %v2524_v47  ;;  %v2684_v51 = vld [vmem:[#allocation2 + $0x1e0] sm:$0xf]  ;;  %v3385_v52 = vld [vmem:[#allocation2 + $0x1f0] sm:$0xf0]  ;;  %v3340_v54 = vld [vmem:[#allocation2 + $0x88] sm:$0xf0] }
  0x19   :  { %1413 = vmatpush.bf16.msrb.mxu1 %v2565_v32  ;;  %1432 = vmatpush.bf16.msrb.mxu2 %v2725_v34  ;;  %v2685_v55 = vor.u32 %v3385_v52, %v2684_v51  ;;  %v2505_v56 = vor.u32 %v3340_v54, %v2504_v53  ;;  %v2664_v57 = vld [vmem:[#allocation2 + $0x1b8] sm:$0xf]  ;;  %v3380_v58 = vld [vmem:[#allocation2 + $0x1c8] sm:$0xf0]  ;;  %v2844_v60 = vld [vmem:[#allocation2 + $0x320] sm:$0xf] }
  0x1a   :  { %v2665_v59 = vor.u32 %v3380_v58, %v2664_v57  ;;  %v3425_v61 = vld [vmem:[#allocation2 + $0x330] sm:$0xf0]  ;;  %v2484_v63 = vld [vmem:[#allocation2 + $0x50] sm:$0xf]  ;;  %v3335_v0 = vld [vmem:[#allocation2 + $0x60] sm:$0xf0] }
  0x1b   :  { %1451 = vmatpush.bf16.msra.mxu3 %v2885_v42  ;;  %v2845_v62 = vor.u32 %v3425_v61, %v2844_v60  ;;  %v2644_v1 = vld [vmem:[#allocation2 + $0x190] sm:$0xf]  ;;  %v2485_v2 = vor.u32 %v3335_v0, %v2484_v63  ;;  %v3375_v3 = vld [vmem:[#allocation2 + $0x1a0] sm:$0xf0]  ;;  %v2824_v5 = vld [vmem:[#allocation2 + $0x2f8] sm:$0xf] }
  0x1c   :  { %v2645_v4 = vor.u32 %v3375_v3, %v2644_v1  ;;  %v3420_v6 = vld [vmem:[#allocation2 + $0x308] sm:$0xf0]  ;;  %v3064_v7 = vld [vmem:[#allocation2 + $0x4d8] sm:$0xf]  ;;  %v2464_v11 = vld [vmem:[#allocation2 + $0x28] sm:$0xf] }
  0x1d   :  { %1414 = vmatpush.bf16.msrb.mxu1 %v2545_v43  ;;  %1433 = vmatpush.bf16.msrb.mxu2 %v2705_v46  ;;  %v2825_v8 = vor.u32 %v3420_v6, %v2824_v5  ;;  %v3480_v9 = vld [vmem:[#allocation2 + $0x4e8] sm:$0xf0]  ;;  %v2624_v13 = vld [vmem:[#allocation2 + $0x168] sm:$0xf]  ;;  %v3370_v15 = vld [vmem:[#allocation2 + $0x178] sm:$0xf0] }
  0x1e   :  { %v3065_v10 = vor.u32 %v3480_v9, %v3064_v7  ;;  %v2804_v17 = vld [vmem:[#allocation2 + $0x2d0] sm:$0xf]  ;;  %v3415_v18 = vld [vmem:[#allocation2 + $0x2e0] sm:$0xf0]  ;;  %v2444_v23 = vld [vmem:[#allocation2] sm:$0xf] }
  0x1f   :  { %1452 = vmatpush.bf16.msra.mxu3 %v2865_v49  ;;  %v3044_v19 = vld [vmem:[#allocation2 + $0x4b0] sm:$0xf]  ;;  %v2805_v20 = vor.u32 %v3415_v18, %v2804_v17  ;;  %v3475_v21 = vld [vmem:[#allocation2 + $0x4c0] sm:$0xf0]  ;;  %v3325_v24 = vld [vmem:[#allocation2 + $0x10] sm:$0xf0] }
  0x20   :  { %1469 = vmatpush.bf16.msra.mxu0 %v3065_v10  ;;  %v3045_v22 = vor.u32 %v3475_v21, %v3044_v19  ;;  %v2604_v25 = vld [vmem:[#allocation2 + $0x140] sm:$0xf]  ;;  %v2445_v26 = vor.u32 %v3325_v24, %v2444_v23  ;;  %v3365_v27 = vld [vmem:[#allocation2 + $0x150] sm:$0xf0]  ;;  %v2784_v29 = vld [vmem:[#allocation2 + $0x2a8] sm:$0xf] }
  0x21   :  { %1415 = vmatpush.bf16.msrb.mxu1 %v2525_v50  ;;  %1434 = vmatpush.bf16.msrb.mxu2 %v2685_v55  ;;  %v2605_v28 = vor.u32 %v3365_v27, %v2604_v25  ;;  %v3410_v30 = vld [vmem:[#allocation2 + $0x2b8] sm:$0xf0]  ;;  %v3024_v31 = vld [vmem:[#allocation2 + $0x488] sm:$0xf]  ;;  %v2586_v36 = vld [vmem:[#allocation2 + $0x12c] sm:$0xf0] }
  0x22   :  { %2438 = vmatmul.msk.bf16.vlgmr.msrb.gmra.mxu3 %vm109_vm0, %v3705_v12  ;;  %2440 = vmatmul.msk.bf16.vlgmr.msrb.gmra.mxu0 %vm109_vm0, %v3705_v12  ;;  %v3330_v12 = vld [vmem:[#allocation2 + $0x38] sm:$0xf0]  ;;  %v2785_v32 = vor.u32 %v3410_v30, %v2784_v29  ;;  %v2764_v38 = vld [vmem:[#allocation2 + $0x280] sm:$0xf]  ;;  %v3405_v39 = vld [vmem:[#allocation2 + $0x290] sm:$0xf0] }
  0x23   :  { %2435 = vmatmul.msk.bf16.gmra.mxu1 %vm109_vm0, %v3716_v16  ;;  %1453 = vmatpush.bf16.msra.mxu3 %v2845_v62  ;;  %v2465_v14 = vor.u32 %v3330_v12, %v2464_v11  ;;  %v3470_v33 = vld [vmem:[#allocation2 + $0x498] sm:$0xf0]  ;;  %v3004_v40 = vld [vmem:[#allocation2 + $0x460] sm:$0xf]  ;;  %v2765_v41 = vor.u32 %v3405_v39, %v2764_v38  ;;  %v3465_v42 = vld [vmem:[#allocation2 + $0x470] sm:$0xf0] }
  0x24   :  { %2437 = vmatmul.msk.bf16.gmra.mxu2 %vm109_vm0, %v3716_v16  ;;  %1470 = vmatpush.bf16.msra.mxu0 %v3045_v22  ;;  %v3025_v34 = vor.u32 %v3470_v33, %v3024_v31  ;;  %v3358_v35 = vld [vmem:[#allocation2 + $0x11c] sm:$0xf]  ;;  %v3005_v43 = vor.u32 %v3465_v42, %v3004_v40  ;;  %v3353_v44 = vld [vmem:[#allocation2 + $0xf4] sm:$0xf]  ;;  %v2566_v45 = vld [vmem:[#allocation2 + $0x104] sm:$0xf0] }
  0x25   :  { %1416 = vmatpush.bf16.msrb.mxu1 %v2505_v56  ;;  %1435 = vmatpush.bf16.msrb.mxu2 %v2665_v59  ;;  %v2589_v37 = vor.u32 %v3358_v35, %v2586_v36  ;;  %v2569_v46 = vor.u32 %v3353_v44, %v2566_v45  ;;  %v3144_v47 = vld [vmem:[#allocation2 + $0x578] sm:$0xf]  ;;  %v3500_v48 = vld [vmem:[#allocation2 + $0x588] sm:$0xf0]  ;;  %v3398_v52 = vld [vmem:[#allocation2 + $0x25c] sm:$0xf] }
  0x26   :  { %v2984_v49 = vld [vmem:[#allocation2 + $0x438] sm:$0xf]  ;;  %v3145_v50 = vor.u32 %v3500_v48, %v3144_v47  ;;  %v3460_v51 = vld [vmem:[#allocation2 + $0x448] sm:$0xf0]  ;;  %v2746_v53 = vld [vmem:[#allocation2 + $0x26c] sm:$0xf0] }
  0x27   :  { %1454 = vmatpush.bf16.msra.mxu3 %v2825_v8  ;;  %v2985_v54 = vor.u32 %v3460_v51, %v2984_v49  ;;  %v2749_v55 = vor.u32 %v3398_v52, %v2746_v53  ;;  %v3348_v56 = vld [vmem:[#allocation2 + $0xcc] sm:$0xf]  ;;  %v2546_v57 = vld [vmem:[#allocation2 + $0xdc] sm:$0xf0]  ;;  %v2964_v59 = vld [vmem:[#allocation2 + $0x410] sm:$0xf] }
  0x28   :  { %1471 = vmatpush.bf16.msra.mxu0 %v3025_v34  ;;  %v2549_v58 = vor.u32 %v3348_v56, %v2546_v57  ;;  %v3455_v60 = vld [vmem:[#allocation2 + $0x420] sm:$0xf0]  ;;  %v3393_v61 = vld [vmem:[#allocation2 + $0x234] sm:$0xf]  ;;  %v2726_v63 = vld [vmem:[#allocation2 + $0x244] sm:$0xf0] }
  0x29   :  { %1417 = vmatpush.bf16.msrb.mxu1 %v2485_v2  ;;  %1436 = vmatpush.bf16.msrb.mxu2 %v2645_v4  ;;  %v2965_v62 = vor.u32 %v3455_v60, %v2964_v59  ;;  %v3124_v0 = vld [vmem:[#allocation2 + $0x550] sm:$0xf]  ;;  %v3495_v1 = vld [vmem:[#allocation2 + $0x560] sm:$0xf0]  ;;  %v2729_v2 = vor.u32 %v3393_v61, %v2726_v63  ;;  %v2526_v5 = vld [vmem:[#allocation2 + $0xb4] sm:$0xf0] }
  0x2a   :  { %v3125_v3 = vor.u32 %v3495_v1, %v3124_v0  ;;  %v3343_v4 = vld [vmem:[#allocation2 + $0xa4] sm:$0xf]  ;;  %v2944_v7 = vld [vmem:[#allocation2 + $0x3e8] sm:$0xf]  ;;  %v3450_v8 = vld [vmem:[#allocation2 + $0x3f8] sm:$0xf0] }
  0x2b   :  { %1455 = vmatpush.bf16.msra.mxu3 %v2805_v20  ;;  %v2529_v6 = vor.u32 %v3343_v4, %v2526_v5  ;;  %v3388_v9 = vld [vmem:[#allocation2 + $0x20c] sm:$0xf]  ;;  %v2945_v10 = vor.u32 %v3450_v8, %v2944_v7  ;;  %v2706_v11 = vld [vmem:[#allocation2 + $0x21c] sm:$0xf0]  ;;  %v3445_v19 = vld [vmem:[#allocation2 + $0x3d0] sm:$0xf0] }
  0x2c   :  { %1472 = vmatpush.bf16.msra.mxu0 %v3005_v43  ;;  %v2709_v12 = vor.u32 %v3388_v9, %v2706_v11  ;;  %v2924_v18 = vld [vmem:[#allocation2 + $0x3c0] sm:$0xf]  ;;  %v3383_v20 = vld [vmem:[#allocation2 + $0x1e4] sm:$0xf]  ;;  %v2686_v23 = vld [vmem:[#allocation2 + $0x1f4] sm:$0xf0] }
  0x2d   :  { %1418 = vmatpush.bf16.msrb.mxu1 %v2465_v14  ;;  %v2506_v14 = vld [vmem:[#allocation2 + $0x8c] sm:$0xf0]  ;;  %v2925_v22 = vor.u32 %v3445_v19, %v2924_v18  ;;  %v2689_v25 = vor.u32 %v3383_v20, %v2686_v23  ;;  %v2486_v27 = vld [vmem:[#allocation2 + $0x64] sm:$0xf0]  ;;  %v3490_v31 = vld [vmem:[#allocation2 + $0x538] sm:$0xf0] }
  0x2e   :  { %v3104_v30 = vld [vmem:[#allocation2 + $0x528] sm:$0xf]  ;;  %v3378_v33 = vld [vmem:[#allocation2 + $0x1bc] sm:$0xf]  ;;  %v2666_v34 = vld [vmem:[#allocation2 + $0x1cc] sm:$0xf0] }
  0x2f   :  { %1456 = vmatpush.bf16.msra.mxu3 %v2785_v32  ;;  %v3105_v32 = vor.u32 %v3490_v31, %v3104_v30  ;;  %v3438_v35 = vld [vmem:[#allocation2 + $0x39c] sm:$0xf]  ;;  %v2669_v38 = vor.u32 %v3378_v33, %v2666_v34  ;;  %v2906_v39 = vld [vmem:[#allocation2 + $0x3ac] sm:$0xf0]  ;;  %v3328_v40 = vld [vmem:[#allocation2 + $0x2c] sm:$0xf] }
  0x30   :  { %1473 = vmatpush.bf16.msra.mxu0 %v2985_v54  ;;  %v2909_v45 = vor.u32 %v3438_v35, %v2906_v39  ;;  %v3373_v48 = vld [vmem:[#allocation2 + $0x194] sm:$0xf]  ;;  %v2646_v49 = vld [vmem:[#allocation2 + $0x1a4] sm:$0xf0]  ;;  %v3084_v53 = vld [vmem:[#allocation2 + $0x500] sm:$0xf] }
  0x31   :  { %1419 = vmatpush.bf16.msrb.mxu1 %v2445_v26  ;;  %v3333_v26 = vld [vmem:[#allocation2 + $0x54] sm:$0xf]  ;;  %v2886_v59 = vld [vmem:[#allocation2 + $0x384] sm:$0xf0]  ;;  %v3323_v60 = vld [vmem:[#allocation2 + $0x4] sm:$0xf] }
  0x32   :  { %2439 = vmatmul.msk.bf16.gmra.mxu3 %vm109_vm0, %v3716_v16  ;;  %2441 = vmatmul.msk.bf16.gmra.mxu0 %vm109_vm0, %v3716_v16  ;;  %v2625_v16 = vor.u32 %v3370_v15, %v2624_v13  ;;  %v3338_v13 = vld [vmem:[#allocation2 + $0x7c] sm:$0xf]  ;;  %v3747_v15 = vld [vmem:[%s3952_s2] sm:$0x1f]  ;;  %v2489_v29 = vor.u32 %v3333_v26, %v2486_v27  ;;  %v3485_v54 = vld [vmem:[#allocation2 + $0x510] sm:$0xf0] }
  0x33   :  { %1457 = vmatpush.bf16.msra.mxu3 %v2765_v41  ;;  %v3750_v24 = vperm.slane %v3747_v15, 1  ;;  %v2466_v41 = vld [vmem:[#allocation2 + $0x3c] sm:$0xf0]  ;;  %v3760_v43 = vperm.slane %v3747_v15, 2  ;;  %v2446_v1 = vld [vmem:[#allocation2 + $0x14] sm:$0xf0] }
  0x34   :  { %1437 = vmatpush.bf16.msrb.mxu2 %v2625_v16  ;;  %1474 = vmatpush.bf16.msra.mxu0 %v2965_v62  ;;  %v2509_v16 = vor.u32 %v3338_v13, %v2506_v14  ;;  %v3368_v4 = vld [vmem:[#allocation2 + $0x16c] sm:$0xf]  ;;  %v2626_v5 = vld [vmem:[#allocation2 + $0x17c] sm:$0xf0]  ;;  %v3478_v13 = vld [vmem:[#allocation2 + $0x4dc] sm:$0xf] }
  0x35   :  { %1492 = vmatpush.bf16.msra.mxu1 %v3145_v50  ;;  %v3433_v50 = vld [vmem:[#allocation2 + $0x374] sm:$0xf]  ;;  %v2629_v7 = vor.u32 %v3368_v4, %v2626_v5  ;;  %v3428_v8 = vld [vmem:[#allocation2 + $0x34c] sm:$0xf]  ;;  %v2866_v9 = vld [vmem:[#allocation2 + $0x35c] sm:$0xf0] }
  0x36   :  { %v2889_v0 = vor.u32 %v3433_v50, %v2886_v59  ;;  %v3066_v14 = vld [vmem:[#allocation2 + $0x4ec] sm:$0xf0]  ;;  %v3363_v20 = vld [vmem:[#allocation2 + $0x144] sm:$0xf]  ;;  %v2846_v26 = vld [vmem:[#allocation2 + $0x334] sm:$0xf0] }
  0x37   :  { %1526 = vmatpush.bf16.msrb.mxu3 %v2749_v55  ;;  %v2649_v55 = vor.u32 %v3373_v48, %v2646_v49  ;;  %v3069_v18 = vor.u32 %v3478_v13, %v3066_v14  ;;  %v3473_v30 = vld [vmem:[#allocation2 + $0x4b4] sm:$0xf]  ;;  %v3046_v31 = vld [vmem:[#allocation2 + $0x4c4] sm:$0xf0]  ;;  %v3026_v48 = vld [vmem:[#allocation2 + $0x49c] sm:$0xf0] }
  0x38   :  { %1438 = vmatpush.bf16.msrb.mxu2 %v2605_v28  ;;  %1475 = vmatpush.bf16.msra.mxu0 %v2945_v10  ;;  %v3753_v28 = vperm.slane %v3747_v15, 0  ;;  %v3413_v49 = vld [vmem:[#allocation2 + $0x2d4] sm:$0xf] }
  0x39   :  { %1493 = vmatpush.bf16.msra.mxu1 %v3125_v3  ;;  %v2449_v3 = vor.u32 %v3323_v60, %v2446_v1  ;;  %v3408_v1 = vld [vmem:[#allocation2 + $0x2ac] sm:$0xf] }
  0x3b   :  { %1527 = vmatpush.bf16.msrb.mxu3 %v2729_v2 }
  0x3c   :  { %1507 = vmatpush.bf16.msra.mxu2 %v2589_v37  ;;  %1476 = vmatpush.bf16.msra.mxu0 %v2925_v22  ;;  %v3423_v22 = vld [vmem:[#allocation2 + $0x324] sm:$0xf] }
  0x3d   :  { %1494 = vmatpush.bf16.msra.mxu1 %v3105_v32  ;;  %v3049_v32 = vor.u32 %v3473_v30, %v3046_v31  ;;  %v2532_v30 = vld [vmem:[#allocation2 + $0xa8] sm:$0xf]  ;;  %v3796_v31 = vperm.slane %v3747_v15, 4 }
  0x3f   :  { %1528 = vmatpush.bf16.msrb.mxu3 %v2709_v12  ;;  %v2869_v12 = vor.u32 %v3428_v8, %v2866_v9 }
  0x40   :  { %1508 = vmatpush.bf16.msra.mxu2 %v2569_v46  ;;  %v2469_v46 = vor.u32 %v3328_v40, %v2466_v41  ;;  %1545 = vmatpush.bf16.msrb.mxu0 %v2909_v45  ;;  %v3781_v41 = vperm.slane %v3747_v15, 3  ;;  %v3361_v45 = vld [vmem:[#allocation2 + $0x130] sm:$0xf0] }
  0x43   :  { %1529 = vmatpush.bf16.msrb.mxu3 %v2689_v25 }
  0x44   :  { %1509 = vmatpush.bf16.msra.mxu2 %v2549_v58  ;;  %v3085_v58 = vor.u32 %v3485_v54, %v3084_v53  ;;  %1546 = vmatpush.bf16.msrb.mxu0 %v2889_v0  ;;  %v3356_v53 = vld [vmem:[#allocation2 + $0x108] sm:$0xf0] }
  0x46   :  { %1495 = vmatpush.bf16.msra.mxu1 %v3085_v58 }
  0x47   :  { %1530 = vmatpush.bf16.msrb.mxu3 %v2669_v38  ;;  %v2826_v38 = vld [vmem:[#allocation2 + $0x30c] sm:$0xf0] }
  0x48   :  { %1510 = vmatpush.bf16.msra.mxu2 %v2529_v6  ;;  %1547 = vmatpush.bf16.msrb.mxu0 %v2869_v12 }
  0x4b   :  { %1531 = vmatpush.bf16.msrb.mxu3 %v2649_v55 }
  0x4c   :  { %1511 = vmatpush.bf16.msra.mxu2 %v2509_v16 }
  0x4f   :  { %1532 = vmatpush.bf16.msrb.mxu3 %v2629_v7 }
  0x50   :  { %1512 = vmatpush.bf16.msra.mxu2 %v2489_v29  ;;  %v2849_v29 = vor.u32 %v3423_v22, %v2846_v26 }
  0x52   :  { %1548 = vmatpush.bf16.msrb.mxu0 %v2849_v29  ;;  %v2766_v29 = vld [vmem:[#allocation2 + $0x294] sm:$0xf0] }
  0x54   :  { %1513 = vmatpush.bf16.msra.mxu2 %v2469_v46 }
  0x58   :  { %1514 = vmatpush.bf16.msra.mxu2 %v2449_v3  ;;  %v3351_v3 = vld [vmem:[#allocation2 + $0xe0] sm:$0xf0] }
  0x8f   :  { %v125_v17 = vpop.f32.mrf.mxu0 }
  0x90   :  { %v144_v21 = vpop.f32.mrf.mxu1  ;;  %v126_v42 = vadd.f32 %v125_v17, %v3753_v28 }
  0x91   :  { %v145_v36 = vadd.f32 %v144_v21, %v3750_v24  ;;  %v2606_v21 = vld [vmem:[#allocation2 + $0x154] sm:$0xf0] }
  0x92   :  { %v211_v61 = vmax.f32 %v126_v42, 0.0  ;;  %v2609_v25 = vor.u32 %v3363_v20, %v2606_v21 }
  0x93   :  { %v212_v56 = vmax.f32 %v145_v36, 0.0  ;;  %v3418_v36 = vld [vmem:[#allocation2 + $0x2fc] sm:$0xf] }
  0x94   :  { %1533 = vmatpush.bf16.msrb.mxu3 %v2609_v25  ;;  %v2829_v42 = vor.u32 %v3418_v36, %v2826_v38  ;;  %v3453_v36 = vld [vmem:[#allocation2 + $0x414] sm:$0xf] }
  0x95   :  { %v3756_v37 = vpop.f32.mrf.mxu3 }
  0x96   :  { %v131_v33 = vadd.f32 %v3756_v37, %v3753_v28  ;;  %1549 = vmatpush.bf16.msrb.mxu0 %v2829_v42  ;;  %v3493_v42 = vld [vmem:[#allocation2 + $0x554] sm:$0xf] }
  0x97   :  { %v163_v44 = vpop.f32.mrf.mxu2  ;;  %v127_v47 = vpop.f32.mrf.mxu0 }
  0x98   :  { %v128_v51 = vadd.f32 %v127_v47, %v3753_v28  ;;  %v146_v52 = vpop.f32.mrf.mxu1  ;;  %v164_v62 = vadd.f32 %v163_v44, %v3760_v43  ;;  %v2592_v44 = vld [vmem:[#allocation2 + $0x120] sm:$0xf]  ;;  %v3468_v47 = vld [vmem:[#allocation2 + $0x48c] sm:$0xf]  ;;  %v221_v54 = vmax.f32 %v131_v33, 0.0 }
  0x99   :  { %v147_v57 = vadd.f32 %v146_v52, %v3750_v24  ;;  %v2593_v46 = vor.u32 %v3361_v45, %v2592_v44  ;;  %v2572_v52 = vld [vmem:[#allocation2 + $0xf8] sm:$0xf]  ;;  %v3346_v33 = vld [vmem:[#allocation2 + $0xb8] sm:$0xf0] }
  0x9a   :  { %v216_v63 = vmax.f32 %v128_v51, 0.0  ;;  %v213_v16 = vmax.f32 %v164_v62, 0.0  ;;  %v3029_v51 = vor.u32 %v3468_v47, %v3026_v48  ;;  %v2573_v55 = vor.u32 %v3356_v53, %v2572_v52  ;;  %v2512_v47 = vld [vmem:[#allocation2 + $0x80] sm:$0xf]  ;;  %v3341_v48 = vld [vmem:[#allocation2 + $0x90] sm:$0xf0] }
  0x9b   :  { %v217_v2 = vmax.f32 %v147_v57, 0.0  ;;  %v3006_v57 = vld [vmem:[#allocation2 + $0x474] sm:$0xf0]  ;;  %v3401_v52 = vld [vmem:[#allocation2 + $0x270] sm:$0xf0] }
  0x9c   :  { %v3765_v6 = vpack.c.bf16 %v216_v63, %v211_v61  ;;  %v2552_v63 = vld [vmem:[#allocation2 + $0xd0] sm:$0xf] }
  0x9d   :  { %v3767_v10 = vpack.c.bf16 %v217_v2, %v212_v56  ;;  %v132_v11 = vpop.f32.mrf.mxu3  ;;  %v3463_v56 = vld [vmem:[#allocation2 + $0x464] sm:$0xf]  ;;  %v2786_v2 = vld [vmem:[#allocation2 + $0x2bc] sm:$0xf0]  ;;  %v2553_v8 = vor.u32 %v3351_v3, %v2552_v63 }
  0x9e   :  { %1420 = vmatmul.bf16.vlgmr.msrb.gmra.mxu1 %v3765_v6  ;;  %v133_v39 = vadd.f32 %v132_v11, %v3753_v28  ;;  %v2806_v28 = vld [vmem:[#allocation2 + $0x2e4] sm:$0xf0]  ;;  %v3009_v62 = vor.u32 %v3463_v56, %v3006_v57  ;;  %v2789_v11 = vor.u32 %v3408_v1, %v2786_v2  ;;  %v2946_v56 = vld [vmem:[#allocation2 + $0x3fc] sm:$0xf0]  ;;  %v3488_v57 = vld [vmem:[#allocation2 + $0x52c] sm:$0xf] }
  0x9f   :  { %v165_v17 = vpop.f32.mrf.mxu2  ;;  %1439 = vmatmul.bf16.vlgmr.msrb.gmra.mxu2 %v3767_v10  ;;  %1564 = vmatpush.bf16.msrb.mxu1 %v3069_v18  ;;  %v3776_v35 = vpop.f32.mrf.mxu0  ;;  %v2809_v61 = vor.u32 %v3413_v49, %v2806_v28  ;;  %v2752_v49 = vld [vmem:[#allocation2 + $0x260] sm:$0xf]  ;;  %v2513_v28 = vor.u32 %v3341_v48, %v2512_v47  ;;  %v3396_v1 = vld [vmem:[#allocation2 + $0x248] sm:$0xf0]  ;;  %v3443_v2 = vld [vmem:[#allocation2 + $0x3c4] sm:$0xf] }
  0xa0   :  { %v166_v19 = vadd.f32 %v165_v17, %v3760_v43  ;;  %v149_v23 = vpop.f32.mrf.mxu1  ;;  %v226_v58 = vmax.f32 %v133_v39, 0.0  ;;  %v3498_v17 = vld [vmem:[#allocation2 + $0x57c] sm:$0xf]  ;;  %v3436_v47 = vld [vmem:[#allocation2 + $0x388] sm:$0xf0] }
  0xa1   :  { %v150_v40 = vadd.f32 %v149_v23, %v3750_v24  ;;  %1550 = vmatpush.bf16.msrb.mxu0 %v2809_v61  ;;  %v3146_v23 = vld [vmem:[#allocation2 + $0x58c] sm:$0xf0]  ;;  %v3052_v48 = vld [vmem:[#allocation2 + $0x4b8] sm:$0xf] }
  0xa2   :  { %v218_v27 = vmax.f32 %v166_v19, 0.0  ;;  %v3787_v9 = vpack.c.bf16 %v226_v58, %v221_v54  ;;  %v3149_v26 = vor.u32 %v3498_v17, %v3146_v23  ;;  %v2753_v54 = vor.u32 %v3401_v52, %v2752_v49  ;;  %v3476_v49 = vld [vmem:[#allocation2 + $0x4c8] sm:$0xf0]  ;;  %v2672_v52 = vld [vmem:[#allocation2 + $0x1c0] sm:$0xf] }
  0xa3   :  { %1565 = vmatpush.bf16.msrb.mxu1 %v3049_v32  ;;  %v222_v59 = vmax.f32 %v150_v40, 0.0  ;;  %v2533_v40 = vor.u32 %v3346_v33, %v2532_v30  ;;  %v3481_v33 = vld [vmem:[#allocation2 + $0x4f0] sm:$0xf0] }
  0xa4   :  { %v3774_v34 = vpack.c.bf16 %v218_v27, %v213_v16  ;;  %v2986_v16 = vld [vmem:[#allocation2 + $0x44c] sm:$0xf0]  ;;  %v3403_v27 = vld [vmem:[#allocation2 + $0x284] sm:$0xf]  ;;  %1587 = vmatpush.bf16.msrb.mxu2 %v3149_v26  ;;  %v3441_v26 = vld [vmem:[#allocation2 + $0x3b0] sm:$0xf0] }
  0xa5   :  { %v182_v37 = vpop.f32.mrf.mxu3  ;;  %1551 = vmatpush.bf16.msrb.mxu0 %v2789_v11  ;;  %v2769_v39 = vor.u32 %v3403_v27, %v2766_v29  ;;  %v3072_v27 = vld [vmem:[#allocation2 + $0x4e0] sm:$0xf] }
  0xa6   :  { %1458 = vmatmul.bf16.vlgmr.msra.gmra.mxu3 %v3774_v34  ;;  %v183_v5 = vadd.f32 %v182_v37, %v3781_v41  ;;  %v3126_v37 = vld [vmem:[#allocation2 + $0x564] sm:$0xf0] }
  0xa7   :  { %v168_v50 = vpop.f32.mrf.mxu2  ;;  %1602 = vmatpush.bf16.msra.mxu3 %v2593_v46  ;;  %1566 = vmatpush.bf16.msrb.mxu1 %v3029_v51  ;;  %v203_v14 = vpop.f32.mrf.mxu0  ;;  %v3129_v15 = vor.u32 %v3493_v42, %v3126_v37  ;;  %v2892_v37 = vld [vmem:[#allocation2 + $0x378] sm:$0xf] }
  0xa8   :  { %v151_v60 = vpop.f32.mrf.mxu1  ;;  %v169_v4 = vadd.f32 %v168_v50, %v3760_v43  ;;  %v214_v19 = vmax.f32 %v183_v5, 0.0  ;;  %v202_v50 = vadd.f32 %v3776_v35, %v3796_v31  ;;  %v204_v51 = vadd.f32 %v203_v14, %v3796_v31  ;;  %v3336_v35 = vld [vmem:[#allocation2 + $0x68] sm:$0xf0]  ;;  %v2472_v14 = vld [vmem:[#allocation2 + $0x30] sm:$0xf] }
  0xa9   :  { %v152_v0 = vadd.f32 %v151_v60, %v3750_v24  ;;  %v3458_v24 = vld [vmem:[#allocation2 + $0x43c] sm:$0xf]  ;;  %1552 = vmatpush.bf16.msrb.mxu0 %v2769_v39  ;;  %1588 = vmatpush.bf16.msrb.mxu2 %v3129_v15  ;;  %v2492_v60 = vld [vmem:[#allocation2 + $0x58] sm:$0xf] }
  0xaa   :  { %v223_v18 = vmax.f32 %v169_v4, 0.0  ;;  %v2989_v22 = vor.u32 %v3458_v24, %v2986_v16  ;;  %v2493_v63 = vor.u32 %v3336_v35, %v2492_v60  ;;  %v215_v3 = vmax.f32 %v202_v50, 0.0  ;;  %v3331_v24 = vld [vmem:[#allocation2 + $0x40] sm:$0xf0]  ;;  %v3326_v39 = vld [vmem:[#allocation2 + $0x18] sm:$0xf0] }
  0xab   :  { %v227_v7 = vmax.f32 %v152_v0, 0.0  ;;  %1603 = vmatpush.bf16.msra.mxu3 %v2573_v55  ;;  %1567 = vmatpush.bf16.msrb.mxu1 %v3009_v62  ;;  %v3448_v55 = vld [vmem:[#allocation2 + $0x3ec] sm:$0xf]  ;;  %v2732_v0 = vld [vmem:[#allocation2 + $0x238] sm:$0xf]  ;;  %v220_v4 = vmax.f32 %v204_v51, 0.0  ;;  %v2893_v51 = vor.u32 %v3436_v47, %v2892_v37 }
  0xac   :  { %v2949_v58 = vor.u32 %v3448_v55, %v2946_v56  ;;  %v2733_v5 = vor.u32 %v3396_v1, %v2732_v0  ;;  %v3471_v35 = vld [vmem:[#allocation2 + $0x4a0] sm:$0xf0]  ;;  %v2852_v1 = vld [vmem:[#allocation2 + $0x328] sm:$0xf]  ;;  %v2792_v37 = vld [vmem:[#allocation2 + $0x2b0] sm:$0xf] }
  0xad   :  { %v3789_v12 = vpack.c.bf16 %v227_v7, %v222_v59  ;;  %v184_v13 = vpop.f32.mrf.mxu3  ;;  %v3106_v59 = vld [vmem:[#allocation2 + $0x53c] sm:$0xf0]  ;;  %v2926_v7 = vld [vmem:[#allocation2 + $0x3d4] sm:$0xf0] }
  0xae   :  { %v185_v21 = vadd.f32 %v184_v13, %v3781_v41  ;;  %1425 = vmatmul.bf16.gmra.mxu1 %v3787_v9  ;;  %v3109_v62 = vor.u32 %v3488_v57, %v3106_v59  ;;  %v2929_v11 = vor.u32 %v3443_v2, %v2926_v7  ;;  %v3086_v13 = vld [vmem:[#allocation2 + $0x514] sm:$0xf0]  ;;  %v2872_v57 = vld [vmem:[#allocation2 + $0x350] sm:$0xf]  ;;  %v3012_v2 = vld [vmem:[#allocation2 + $0x468] sm:$0xf] }
  0xaf   :  { %v170_v20 = vpop.f32.mrf.mxu2  ;;  %1444 = vmatmul.bf16.gmra.mxu2 %v3789_v12  ;;  %1604 = vmatpush.bf16.msra.mxu3 %v2553_v8  ;;  %v3807_v61 = vpop.f32.mrf.mxu0  ;;  %v3483_v8 = vld [vmem:[#allocation2 + $0x504] sm:$0xf]  ;;  %v3032_v59 = vld [vmem:[#allocation2 + $0x490] sm:$0xf] }
  0xb0   :  { %v171_v25 = vadd.f32 %v170_v20, %v3760_v43  ;;  %v219_v32 = vmax.f32 %v185_v21, 0.0  ;;  %1568 = vmatpush.bf16.msrb.mxu1 %v2989_v22  ;;  %v2966_v43 = vld [vmem:[#allocation2 + $0x424] sm:$0xf0]  ;;  %1589 = vmatpush.bf16.msrb.mxu2 %v3109_v62  ;;  %v3089_v17 = vor.u32 %v3483_v8, %v3086_v13  ;;  %v2473_v20 = vor.u32 %v3331_v24, %v2472_v14  ;;  %v2652_v62 = vld [vmem:[#allocation2 + $0x198] sm:$0xf] }
  0xb1   :  { %v2969_v45 = vor.u32 %v3453_v36, %v2966_v43  ;;  %v3810_v21 = vpack.c.bf16 %v220_v4, %v215_v3  ;;  %v3073_v36 = vor.u32 %v3481_v33, %v3072_v27  ;;  %v3033_v0 = vor.u32 %v3471_v35, %v3032_v59  ;;  %v3371_v13 = vld [vmem:[#allocation2 + $0x180] sm:$0xf0]  ;;  %v3416_v27 = vld [vmem:[#allocation2 + $0x2e8] sm:$0xf0]  ;;  %v3446_v59 = vld [vmem:[#allocation2 + $0x3d8] sm:$0xf0] }
  0xb2   :  { %v228_v38 = vmax.f32 %v171_v25, 0.0  ;;  %v3798_v44 = vpack.c.bf16 %v219_v32, %v214_v19  ;;  %v3391_v19 = vld [vmem:[#allocation2 + $0x220] sm:$0xf0]  ;;  %v2912_v25 = vld [vmem:[#allocation2 + $0x3a0] sm:$0xf] }
  0xb3   :  { %1605 = vmatpush.bf16.msra.mxu3 %v2533_v40  ;;  %v2913_v32 = vor.u32 %v3441_v26, %v2912_v25  ;;  %v2692_v40 = vld [vmem:[#allocation2 + $0x1e8] sm:$0xf]  ;;  %v3366_v25 = vld [vmem:[#allocation2 + $0x158] sm:$0xf0]  ;;  %v2812_v26 = vld [vmem:[#allocation2 + $0x2d8] sm:$0xf] }
  0xb4   :  { %v3800_v46 = vpack.c.bf16 %v228_v38, %v223_v18  ;;  %1477 = vmatmul.bf16.vlgmr.msra.gmra.mxu0 %v3798_v44  ;;  %1569 = vmatpush.bf16.msrb.mxu1 %v2969_v45  ;;  %v2712_v18 = vld [vmem:[#allocation2 + $0x210] sm:$0xf]  ;;  %v2452_v38 = vld [vmem:[#allocation2 + $0x8] sm:$0xf]  ;;  %v3386_v45 = vld [vmem:[#allocation2 + $0x1f8] sm:$0xf0]  ;;  %v2813_v33 = vor.u32 %v3416_v27, %v2812_v26 }
  0xb5   :  { %v187_v53 = vpop.f32.mrf.mxu3  ;;  %1621 = vmatpush.bf16.msra.mxu0 %v2753_v54  ;;  %v2713_v22 = vor.u32 %v3391_v19, %v2712_v18  ;;  %1590 = vmatpush.bf16.msrb.mxu2 %v3089_v17  ;;  %v2453_v42 = vor.u32 %v3326_v39, %v2452_v38  ;;  %v2693_v15 = vor.u32 %v3386_v45, %v2692_v40  ;;  %v3421_v17 = vld [vmem:[#allocation2 + $0x310] sm:$0xf0]  ;;  %v2992_v18 = vld [vmem:[#allocation2 + $0x440] sm:$0xf]  ;;  %v3359_v40 = vld [vmem:[#allocation2 + $0x124] sm:$0xf] }
  0xb6   :  { %1463 = vmatmul.bf16.gmra.mxu3 %v3800_v46  ;;  %v188_v16 = vadd.f32 %v187_v53, %v3781_v41  ;;  %v3381_v53 = vld [vmem:[#allocation2 + $0x1d0] sm:$0xf0]  ;;  %v207_v54 = vadd.f32 %v3807_v61, %v3796_v31  ;;  %v3426_v61 = vld [vmem:[#allocation2 + $0x338] sm:$0xf0]  ;;  %v3152_v38 = vld [vmem:[#allocation2 + $0x580] sm:$0xf] }
  0xb7   :  { %1606 = vmatpush.bf16.msra.mxu3 %v2513_v28  ;;  %v3053_v28 = vor.u32 %v3476_v49, %v3052_v48  ;;  %v2673_v56 = vor.u32 %v3381_v53, %v2672_v52  ;;  %v2853_v4 = vor.u32 %v3426_v61, %v2852_v1  ;;  %v3501_v39 = vld [vmem:[#allocation2 + $0x590] sm:$0xf0]  ;;  %v3451_v48 = vld [vmem:[#allocation2 + $0x400] sm:$0xf0]  ;;  %v3132_v49 = vld [vmem:[#allocation2 + $0x558] sm:$0xf] }
  0xb8   :  { %1570 = vmatpush.bf16.msrb.mxu1 %v2949_v58  ;;  %v224_v29 = vmax.f32 %v188_v16, 0.0  ;;  %v3431_v58 = vld [vmem:[#allocation2 + $0x360] sm:$0xf0]  ;;  %v2832_v16 = vld [vmem:[#allocation2 + $0x300] sm:$0xf] }
  0xb9   :  { %1622 = vmatpush.bf16.msra.mxu0 %v2733_v5  ;;  %v2873_v60 = vor.u32 %v3431_v58, %v2872_v57  ;;  %v3466_v5 = vld [vmem:[#allocation2 + $0x478] sm:$0xf0]  ;;  %v2833_v19 = vor.u32 %v3421_v17, %v2832_v16  ;;  %v2932_v58 = vld [vmem:[#allocation2 + $0x3c8] sm:$0xf]  ;;  %v3112_v35 = vld [vmem:[#allocation2 + $0x530] sm:$0xf] }
  0xba   :  { %v3013_v8 = vor.u32 %v3466_v5, %v3012_v2  ;;  %v3354_v53 = vld [vmem:[#allocation2 + $0xfc] sm:$0xf]  ;;  %v2554_v1 = vld [vmem:[#allocation2 + $0xe4] sm:$0xf0]  ;;  %v2534_v17 = vld [vmem:[#allocation2 + $0xbc] sm:$0xf0] }
  0xbb   :  { %1607 = vmatpush.bf16.msra.mxu3 %v2493_v63  ;;  %v3376_v63 = vld [vmem:[#allocation2 + $0x1a8] sm:$0xf0]  ;;  %v3406_v57 = vld [vmem:[#allocation2 + $0x298] sm:$0xf0]  ;;  %v3339_v27 = vld [vmem:[#allocation2 + $0x84] sm:$0xf] }
  0xbc   :  { %1571 = vmatpush.bf16.msrb.mxu1 %v2929_v11  ;;  %v2653_v7 = vor.u32 %v3376_v63, %v2652_v62  ;;  %v2632_v11 = vld [vmem:[#allocation2 + $0x170] sm:$0xf]  ;;  %v3491_v62 = vld [vmem:[#allocation2 + $0x540] sm:$0xf0]  ;;  %v3349_v63 = vld [vmem:[#allocation2 + $0xd4] sm:$0xf] }
  0xbd   :  { %v189_v23 = vpop.f32.mrf.mxu3  ;;  %1623 = vmatpush.bf16.msra.mxu0 %v2713_v22  ;;  %v2633_v24 = vor.u32 %v3371_v13, %v2632_v11  ;;  %v3113_v61 = vor.u32 %v3491_v62, %v3112_v35  ;;  %v2557_v2 = vor.u32 %v3349_v63, %v2554_v1  ;;  %v3092_v11 = vld [vmem:[#allocation2 + $0x508] sm:$0xf]  ;;  %v3486_v13 = vld [vmem:[#allocation2 + $0x518] sm:$0xf0]  ;;  %v3379_v62 = vld [vmem:[#allocation2 + $0x1c4] sm:$0xf] }
  0xbe   :  { %v190_v30 = vadd.f32 %v189_v23, %v3781_v41  ;;  %3162 = vmatmul.msk.bf16.vlgmr.msra.gmra.mxu1 %vm1405_vm1, %v3810_v21  ;;  %v208_v41 = vpop.f32.mrf.mxu0  ;;  %v2612_v23 = vld [vmem:[#allocation2 + $0x148] sm:$0xf]  ;;  %v3093_v16 = vor.u32 %v3486_v13, %v3092_v11  ;;  %v2674_v63 = vld [vmem:[#allocation2 + $0x1d4] sm:$0xf0] }
  0xbf   :  { %1515 = vmatmul.bf16.vlgmr.msra.gmra.mxu2 %v3765_v6  ;;  %1608 = vmatpush.bf16.msra.mxu3 %v2473_v20  ;;  %v209_v55 = vadd.f32 %v208_v41, %v3796_v31  ;;  %v225_v31 = vmax.f32 %v207_v54, 0.0  ;;  %v3461_v20 = vld [vmem:[#allocation2 + $0x450] sm:$0xf0]  ;;  %v3411_v41 = vld [vmem:[#allocation2 + $0x2c0] sm:$0xf0]  ;;  %v2677_v1 = vor.u32 %v3379_v62, %v2674_v63 }
  0xc0   :  { %v229_v43 = vmax.f32 %v190_v30, 0.0  ;;  %1640 = vmatpush.bf16.msra.mxu1 %v2913_v32  ;;  %1659 = vmatpush.bf16.msra.mxu2 %v3073_v36  ;;  %v2993_v22 = vor.u32 %v3461_v20, %v2992_v18  ;;  %v3456_v30 = vld [vmem:[#allocation2 + $0x428] sm:$0xf0]  ;;  %v2613_v32 = vor.u32 %v3366_v25, %v2612_v23  ;;  %v2793_v47 = vor.u32 %v3411_v41, %v2792_v37  ;;  %v2574_v54 = vld [vmem:[#allocation2 + $0x10c] sm:$0xf0] }
  0xc1   :  { %1624 = vmatpush.bf16.msra.mxu0 %v2693_v15  ;;  %v230_v3 = vmax.f32 %v209_v55, 0.0  ;;  %v2952_v15 = vld [vmem:[#allocation2 + $0x3f0] sm:$0xf]  ;;  %v2772_v55 = vld [vmem:[#allocation2 + $0x288] sm:$0xf] }
  0xc2   :  { %v3816_v50 = vpack.c.bf16 %v229_v43, %v224_v29  ;;  %v2972_v29 = vld [vmem:[#allocation2 + $0x418] sm:$0xf]  ;;  %v3153_v43 = vor.u32 %v3501_v39, %v3152_v38  ;;  %v3394_v18 = vld [vmem:[#allocation2 + $0x23c] sm:$0xf]  ;;  %v2894_v25 = vld [vmem:[#allocation2 + $0x38c] sm:$0xf0] }
  0xc3   :  { %1609 = vmatpush.bf16.msra.mxu3 %v2453_v42  ;;  %v3823_v14 = vpack.c.bf16 %v230_v3, %v225_v31  ;;  %v2973_v36 = vor.u32 %v3456_v30, %v2972_v29  ;;  %v2594_v42 = vld [vmem:[#allocation2 + $0x134] sm:$0xf0]  ;;  %v3399_v31 = vld [vmem:[#allocation2 + $0x264] sm:$0xf]  ;;  %v3434_v23 = vld [vmem:[#allocation2 + $0x37c] sm:$0xf] }
  0xc4   :  { %1482 = vmatmul.bf16.gmra.mxu0 %v3816_v50  ;;  %1641 = vmatpush.bf16.msra.mxu1 %v2893_v51  ;;  %v2597_v45 = vor.u32 %v3359_v40, %v2594_v42  ;;  %v3496_v51 = vld [vmem:[#allocation2 + $0x568] sm:$0xf0]  ;;  %v2754_v3 = vld [vmem:[#allocation2 + $0x274] sm:$0xf0]  ;;  %v2897_v26 = vor.u32 %v3434_v23, %v2894_v25  ;;  %v3479_v30 = vld [vmem:[#allocation2 + $0x4e4] sm:$0xf] }
  0xc5   :  { %1660 = vmatpush.bf16.msra.mxu2 %v3053_v28  ;;  %1625 = vmatpush.bf16.msra.mxu0 %v2673_v56  ;;  %v2953_v28 = vor.u32 %v3451_v48, %v2952_v15  ;;  %v3133_v52 = vor.u32 %v3496_v51, %v3132_v49  ;;  %v2577_v56 = vor.u32 %v3354_v53, %v2574_v54  ;;  %v2514_v29 = vld [vmem:[#allocation2 + $0x94] sm:$0xf0]  ;;  %v3389_v38 = vld [vmem:[#allocation2 + $0x214] sm:$0xf]  ;;  %v2714_v39 = vld [vmem:[#allocation2 + $0x224] sm:$0xf0] }
  0xc6   :  { %1534 = vmatmul.bf16.vlgmr.msrb.gmra.mxu3 %v3767_v10  ;;  %v2757_v5 = vor.u32 %v3399_v31, %v2754_v3  ;;  %v3429_v40 = vld [vmem:[#allocation2 + $0x354] sm:$0xf]  ;;  %v2874_v42 = vld [vmem:[#allocation2 + $0x364] sm:$0xf0]  ;;  %v2494_v37 = vld [vmem:[#allocation2 + $0x6c] sm:$0xf0] }
  0xc7   :  { %1682 = vmatpush.bf16.msrb.mxu3 %v3153_v43  ;;  %v2717_v43 = vor.u32 %v3389_v38, %v2714_v39  ;;  %v2877_v41 = vor.u32 %v3429_v40, %v2874_v42  ;;  %v3474_v15 = vld [vmem:[#allocation2 + $0x4bc] sm:$0xf]  ;;  %v3384_v48 = vld [vmem:[#allocation2 + $0x1ec] sm:$0xf]  ;;  %v2694_v51 = vld [vmem:[#allocation2 + $0x1fc] sm:$0xf0] }
  0xc8   :  { %1642 = vmatpush.bf16.msra.mxu1 %v2873_v60  ;;  %v2773_v60 = vor.u32 %v3406_v57, %v2772_v55  ;;  %v2697_v54 = vor.u32 %v3384_v48, %v2694_v51  ;;  %v3469_v55 = vld [vmem:[#allocation2 + $0x494] sm:$0xf]  ;;  %v3324_v31 = vld [vmem:[#allocation2 + $0xc] sm:$0xf]  ;;  %v2454_v3 = vld [vmem:[#allocation2 + $0x1c] sm:$0xf0] }
  0xc9   :  { %1661 = vmatpush.bf16.msra.mxu2 %v3033_v0  ;;  %1626 = vmatpush.bf16.msra.mxu0 %v2653_v7  ;;  %v2933_v0 = vor.u32 %v3446_v59, %v2932_v58  ;;  %v2914_v7 = vld [vmem:[#allocation2 + $0x3b4] sm:$0xf0]  ;;  %v3329_v57 = vld [vmem:[#allocation2 + $0x34] sm:$0xf]  ;;  %v2474_v58 = vld [vmem:[#allocation2 + $0x44] sm:$0xf0]  ;;  %v2457_v11 = vor.u32 %v3324_v31, %v2454_v3 }
  0xca   :  { %v3034_v59 = vld [vmem:[#allocation2 + $0x4a4] sm:$0xf0]  ;;  %v2477_v35 = vor.u32 %v3329_v57, %v2474_v58  ;;  %v3369_v23 = vld [vmem:[#allocation2 + $0x174] sm:$0xf]  ;;  %v3364_v38 = vld [vmem:[#allocation2 + $0x14c] sm:$0xf] }
  0xcb   :  { %1683 = vmatpush.bf16.msrb.mxu3 %v3133_v52  ;;  %v2854_v52 = vld [vmem:[#allocation2 + $0x33c] sm:$0xf0]  ;;  %v2634_v25 = vld [vmem:[#allocation2 + $0x184] sm:$0xf0]  ;;  %v3397_v63 = vld [vmem:[#allocation2 + $0x250] sm:$0xf0] }
  0xcc   :  { %1643 = vmatpush.bf16.msra.mxu1 %v2853_v4  ;;  %v3439_v4 = vld [vmem:[#allocation2 + $0x3a4] sm:$0xf]  ;;  %v2614_v39 = vld [vmem:[#allocation2 + $0x15c] sm:$0xf0]  ;;  %v2600_v51 = vld [vmem:[#allocation2 + $0x128] sm:$0xf] }
  0xcd   :  { %1662 = vmatpush.bf16.msra.mxu2 %v3013_v8  ;;  %1627 = vmatpush.bf16.msra.mxu0 %v2633_v24  ;;  %v2917_v8 = vor.u32 %v3439_v4, %v2914_v7  ;;  %v3344_v24 = vld [vmem:[#allocation2 + $0xac] sm:$0xf]  ;;  %v3374_v7 = vld [vmem:[#allocation2 + $0x19c] sm:$0xf]  ;;  %v2617_v40 = vor.u32 %v3364_v38, %v2614_v39  ;;  %v2774_v42 = vld [vmem:[#allocation2 + $0x29c] sm:$0xf0] }
  0xce   :  { %3163 = vmatmul.msk.bf16.gmra.mxu1 %vm1405_vm1, %v3823_v14  ;;  %v2537_v20 = vor.u32 %v3344_v24, %v2534_v17  ;;  %v3464_v4 = vld [vmem:[#allocation2 + $0x46c] sm:$0xf]  ;;  %v2814_v17 = vld [vmem:[#allocation2 + $0x2ec] sm:$0xf0]  ;;  %v2934_v57 = vld [vmem:[#allocation2 + $0x3dc] sm:$0xf0] }
  0xcf   :  { %1520 = vmatmul.bf16.gmra.mxu2 %v3787_v9  ;;  %1684 = vmatpush.bf16.msrb.mxu3 %v3113_v61  ;;  %v2834_v61 = vld [vmem:[#allocation2 + $0x314] sm:$0xf0]  ;;  %v3494_v31 = vld [vmem:[#allocation2 + $0x55c] sm:$0xf]  ;;  %v3134_v3 = vld [vmem:[#allocation2 + $0x56c] sm:$0xf0] }
  0xd0   :  { %1644 = vmatpush.bf16.msra.mxu1 %v2833_v19  ;;  %v2734_v19 = vld [vmem:[#allocation2 + $0x24c] sm:$0xf0]  ;;  %v2520_v38 = vld [vmem:[#allocation2 + $0x88] sm:$0xf]  ;;  %v3342_v39 = vld [vmem:[#allocation2 + $0x98] sm:$0xf0] }
  0xd1   :  { %1663 = vmatpush.bf16.msra.mxu2 %v2993_v22  ;;  %1628 = vmatpush.bf16.msra.mxu0 %v2613_v32  ;;  %v2737_v22 = vor.u32 %v3394_v18, %v2734_v19  ;;  %v3074_v32 = vld [vmem:[#allocation2 + $0x4f4] sm:$0xf0]  ;;  %v3459_v19 = vld [vmem:[#allocation2 + $0x444] sm:$0xf] }
  0xd3   :  { %1685 = vmatpush.bf16.msrb.mxu3 %v3093_v16  ;;  %v3414_v16 = vld [vmem:[#allocation2 + $0x2dc] sm:$0xf] }
  0xd4   :  { %1553 = vmatmul.bf16.vlgmr.msrb.gmra.mxu0 %v3774_v34  ;;  %1645 = vmatpush.bf16.msra.mxu1 %v2813_v33  ;;  %v2517_v33 = vor.u32 %v3339_v27, %v2514_v29  ;;  %v2817_v18 = vor.u32 %v3414_v16, %v2814_v17  ;;  %v2637_v27 = vor.u32 %v3369_v23, %v2634_v25  ;;  %v2794_v29 = vld [vmem:[#allocation2 + $0x2c4] sm:$0xf0]  ;;  %v2900_v16 = vld [vmem:[#allocation2 + $0x380] sm:$0xf]  ;;  %v3437_v17 = vld [vmem:[#allocation2 + $0x390] sm:$0xf0] }
  0xd5   :  { %1664 = vmatpush.bf16.msra.mxu2 %v2973_v36  ;;  %1697 = vmatpush.bf16.msrb.mxu0 %v2597_v45  ;;  %v3077_v36 = vor.u32 %v3479_v30, %v3074_v32  ;;  %v3334_v45 = vld [vmem:[#allocation2 + $0x5c] sm:$0xf]  ;;  %v2974_v32 = vld [vmem:[#allocation2 + $0x42c] sm:$0xf0]  ;;  %v3387_v25 = vld [vmem:[#allocation2 + $0x200] sm:$0xf0] }
  0xd6   :  { %1539 = vmatmul.bf16.gmra.mxu3 %v3789_v12  ;;  %v2497_v53 = vor.u32 %v3334_v45, %v2494_v37  ;;  %v3454_v30 = vld [vmem:[#allocation2 + $0x41c] sm:$0xf]  ;;  %v3449_v37 = vld [vmem:[#allocation2 + $0x3f4] sm:$0xf] }
  0xd8   :  { %1646 = vmatpush.bf16.msra.mxu1 %v2793_v47  ;;  %v3054_v47 = vld [vmem:[#allocation2 + $0x4cc] sm:$0xf0] }
  0xd9   :  { %1665 = vmatpush.bf16.msra.mxu2 %v2953_v28  ;;  %1698 = vmatpush.bf16.msrb.mxu0 %v2577_v56  ;;  %v3057_v49 = vor.u32 %v3474_v15, %v3054_v47  ;;  %v3424_v28 = vld [vmem:[#allocation2 + $0x32c] sm:$0xf]  ;;  %v3499_v15 = vld [vmem:[#allocation2 + $0x584] sm:$0xf]  ;;  %v3154_v47 = vld [vmem:[#allocation2 + $0x594] sm:$0xf0] }
  0xda   :  { %v2857_v56 = vor.u32 %v3424_v28, %v2854_v52  ;;  %v3362_v28 = vld [vmem:[#allocation2 + $0x138] sm:$0xf0]  ;;  %v2760_v52 = vld [vmem:[#allocation2 + $0x268] sm:$0xf] }
  0xdc   :  { %1647 = vmatpush.bf16.msra.mxu1 %v2773_v60  ;;  %v3037_v60 = vor.u32 %v3469_v55, %v3034_v59  ;;  %v2580_v59 = vld [vmem:[#allocation2 + $0x100] sm:$0xf] }
  0xdd   :  { %1666 = vmatpush.bf16.msra.mxu2 %v2933_v0  ;;  %1699 = vmatpush.bf16.msrb.mxu0 %v2557_v2  ;;  %v3419_v0 = vld [vmem:[#allocation2 + $0x304] sm:$0xf] }
  0xde   :  { %1572 = vmatmul.bf16.vlgmr.msrb.gmra.mxu1 %v3798_v44  ;;  %v2837_v2 = vor.u32 %v3419_v0, %v2834_v61  ;;  %v3442_v61 = vld [vmem:[#allocation2 + $0x3b8] sm:$0xf0] }
  0xdf   :  { %3164 = vmatmul.msk.bf16.vlgmr.msrb.gmra.mxu2 %vm1405_vm1, %v3810_v21 }
  0xe0   :  { %1716 = vmatpush.bf16.msrb.mxu1 %v2757_v5  ;;  %v3014_v5 = vld [vmem:[#allocation2 + $0x47c] sm:$0xf0] }
  0xe1   :  { %1735 = vmatpush.bf16.msrb.mxu2 %v2917_v8  ;;  %1700 = vmatpush.bf16.msrb.mxu0 %v2537_v20  ;;  %v2654_v8 = vld [vmem:[#allocation2 + $0x1ac] sm:$0xf0]  ;;  %v3017_v13 = vor.u32 %v3464_v4, %v3014_v5  ;;  %v2994_v20 = vld [vmem:[#allocation2 + $0x454] sm:$0xf0]  ;;  %v3137_v5 = vor.u32 %v3494_v31, %v3134_v3  ;;  %v2820_v31 = vld [vmem:[#allocation2 + $0x2e0] sm:$0xf] }
  0xe2   :  { %v2657_v24 = vor.u32 %v3374_v7, %v2654_v8  ;;  %v2560_v4 = vld [vmem:[#allocation2 + $0xd8] sm:$0xf]  ;;  %v3352_v7 = vld [vmem:[#allocation2 + $0xe8] sm:$0xf0]  ;;  %v3417_v3 = vld [vmem:[#allocation2 + $0x2f0] sm:$0xf0] }
  0xe3   :  { %v2720_v8 = vld [vmem:[#allocation2 + $0x218] sm:$0xf] }
  0xe4   :  { %1558 = vmatmul.bf16.gmra.mxu0 %v3800_v46  ;;  %1717 = vmatpush.bf16.msrb.mxu1 %v2737_v22  ;;  %v2997_v22 = vor.u32 %v3459_v19, %v2994_v20  ;;  %v2540_v19 = vld [vmem:[#allocation2 + $0xb0] sm:$0xf]  ;;  %v3347_v20 = vld [vmem:[#allocation2 + $0xc0] sm:$0xf0] }
  0xe5   :  { %1736 = vmatpush.bf16.msrb.mxu2 %v2897_v26  ;;  %1701 = vmatpush.bf16.msrb.mxu0 %v2517_v33  ;;  %v3409_v26 = vld [vmem:[#allocation2 + $0x2b4] sm:$0xf]  ;;  %v2541_v23 = vor.u32 %v3347_v20, %v2540_v19  ;;  %v2800_v20 = vld [vmem:[#allocation2 + $0x2b8] sm:$0xf] }
  0xe6   :  { %1610 = vmatmul.bf16.vlgmr.msra.gmra.mxu3 %v3765_v6  ;;  %v2797_v33 = vor.u32 %v3409_v26, %v2794_v29  ;;  %v3114_v29 = vld [vmem:[#allocation2 + $0x544] sm:$0xf0] }
  0xe7   :  { %1754 = vmatpush.bf16.msra.mxu3 %v3077_v36  ;;  %v2977_v36 = vor.u32 %v3454_v30, %v2974_v32  ;;  %v2880_v30 = vld [vmem:[#allocation2 + $0x358] sm:$0xf] }
  0xe8   :  { %1718 = vmatpush.bf16.msrb.mxu1 %v2717_v43  ;;  %v3404_v43 = vld [vmem:[#allocation2 + $0x28c] sm:$0xf] }
  0xe9   :  { %1737 = vmatpush.bf16.msrb.mxu2 %v2877_v41  ;;  %1702 = vmatpush.bf16.msrb.mxu0 %v2497_v53  ;;  %v2777_v45 = vor.u32 %v3404_v43, %v2774_v42  ;;  %v2954_v41 = vld [vmem:[#allocation2 + $0x404] sm:$0xf0]  ;;  %v2601_v53 = vor.u32 %v3362_v28, %v2600_v51  ;;  %v2521_v43 = vor.u32 %v3342_v39, %v2520_v38  ;;  %v3382_v42 = vld [vmem:[#allocation2 + $0x1d8] sm:$0xf0]  ;;  %v2500_v51 = vld [vmem:[#allocation2 + $0x60] sm:$0xf] }
  0xea   :  { %v2957_v48 = vor.u32 %v3449_v37, %v2954_v41  ;;  %v3484_v37 = vld [vmem:[#allocation2 + $0x50c] sm:$0xf]  ;;  %v3094_v41 = vld [vmem:[#allocation2 + $0x51c] sm:$0xf0]  ;;  %v3337_v28 = vld [vmem:[#allocation2 + $0x70] sm:$0xf0] }
  0xeb   :  { %1755 = vmatpush.bf16.msra.mxu3 %v3057_v49  ;;  %v3157_v49 = vor.u32 %v3499_v15, %v3154_v47  ;;  %v2860_v15 = vld [vmem:[#allocation2 + $0x330] sm:$0xf]  ;;  %v3097_v47 = vor.u32 %v3484_v37, %v3094_v41  ;;  %v3407_v38 = vld [vmem:[#allocation2 + $0x2a0] sm:$0xf0] }
  0xec   :  { %1719 = vmatpush.bf16.msrb.mxu1 %v2697_v54  ;;  %v3402_v54 = vld [vmem:[#allocation2 + $0x278] sm:$0xf0]  ;;  %v3020_v39 = vld [vmem:[#allocation2 + $0x470] sm:$0xf] }
  0xed   :  { %1738 = vmatpush.bf16.msrb.mxu2 %v2857_v56  ;;  %1703 = vmatpush.bf16.msrb.mxu0 %v2477_v35  ;;  %v2761_v55 = vor.u32 %v3402_v54, %v2760_v52  ;;  %v3444_v56 = vld [vmem:[#allocation2 + $0x3cc] sm:$0xf]  ;;  %v2740_v35 = vld [vmem:[#allocation2 + $0x240] sm:$0xf]  ;;  %v3377_v54 = vld [vmem:[#allocation2 + $0x1b0] sm:$0xf0] }
  0xee   :  { %1577 = vmatmul.bf16.gmra.mxu1 %v3816_v50  ;;  %v2937_v58 = vor.u32 %v3444_v56, %v2934_v57  ;;  %v2741_v0 = vor.u32 %v3397_v63, %v2740_v35  ;;  %v2660_v52 = vld [vmem:[#allocation2 + $0x1a0] sm:$0xf]  ;;  %v2840_v56 = vld [vmem:[#allocation2 + $0x308] sm:$0xf]  ;;  %v3422_v57 = vld [vmem:[#allocation2 + $0x318] sm:$0xf0] }
  0xef   :  { %3165 = vmatmul.msk.bf16.gmra.mxu2 %vm1405_vm1, %v3823_v14  ;;  %1756 = vmatpush.bf16.msra.mxu3 %v3037_v60  ;;  %v3357_v60 = vld [vmem:[#allocation2 + $0x110] sm:$0xf0]  ;;  %v3332_v63 = vld [vmem:[#allocation2 + $0x48] sm:$0xf0] }
  0xf0   :  { %1720 = vmatpush.bf16.msrb.mxu1 %v2677_v1  ;;  %v2581_v62 = vor.u32 %v3357_v60, %v2580_v59  ;;  %v2920_v1 = vld [vmem:[#allocation2 + $0x3a8] sm:$0xf]  ;;  %v2841_v59 = vor.u32 %v3422_v57, %v2840_v56  ;;  %v3482_v60 = vld [vmem:[#allocation2 + $0x4f8] sm:$0xf0]  ;;  %v3509_v37 = vld [vmem:[#allocation4 + $0x30] sm:$0xff] }
  0xf1   :  { %1739 = vmatpush.bf16.msrb.mxu2 %v2837_v2  ;;  %1704 = vmatpush.bf16.msrb.mxu0 %v2457_v11  ;;  %v2921_v2 = vor.u32 %v3442_v61, %v2920_v1  ;;  %v3392_v11 = vld [vmem:[#allocation2 + $0x228] sm:$0xf0] }
  0xf2   :  { %v3372_v61 = vld [vmem:[#allocation2 + $0x188] sm:$0xf0] }
  0xf3   :  { %1757 = vmatpush.bf16.msra.mxu3 %v3017_v13  ;;  %v2561_v13 = vor.u32 %v3352_v7, %v2560_v4  ;;  %v3060_v4 = vld [vmem:[#allocation2 + $0x4c0] sm:$0xf]  ;;  %v3477_v7 = vld [vmem:[#allocation2 + $0x4d0] sm:$0xf0] }
  0xf4   :  { %1629 = vmatmul.bf16.vlgmr.msra.gmra.mxu0 %v3767_v10  ;;  %1721 = vmatpush.bf16.msrb.mxu1 %v2657_v24  ;;  %v2721_v24 = vor.u32 %v3392_v11, %v2720_v8  ;;  %v3061_v8 = vor.u32 %v3477_v7, %v3060_v4  ;;  %v2460_v11 = vld [vmem:[#allocation2 + $0x10] sm:$0xf]  ;;  %v3518_v4 = vld [vmem:[#allocation4 + $0x78] sm:$0xff] }
  0xf5   :  { %1740 = vmatpush.bf16.msrb.mxu2 %v2817_v18  ;;  %1777 = vmatpush.bf16.msra.mxu0 %v3157_v49  ;;  %v2901_v18 = vor.u32 %v3437_v17, %v2900_v16  ;;  %v3367_v17 = vld [vmem:[#allocation2 + $0x160] sm:$0xf0] }
  0xf6   :  { %1615 = vmatmul.bf16.gmra.mxu3 %v3787_v9 }
  0xf7   :  { %1758 = vmatpush.bf16.msra.mxu3 %v2997_v22  ;;  %v2700_v22 = vld [vmem:[#allocation2 + $0x1f0] sm:$0xf] }
  0xf8   :  { %1722 = vmatpush.bf16.msrb.mxu1 %v2637_v27  ;;  %v2701_v26 = vor.u32 %v3387_v25, %v2700_v22  ;;  %v3489_v27 = vld [vmem:[#allocation2 + $0x534] sm:$0xf]  ;;  %v3412_v22 = vld [vmem:[#allocation2 + $0x2c8] sm:$0xf0] }
  0xf9   :  { %1741 = vmatpush.bf16.msrb.mxu2 %v2797_v33  ;;  %1778 = vmatpush.bf16.msra.mxu0 %v3137_v5  ;;  %v3117_v32 = vor.u32 %v3489_v27, %v3114_v29  ;;  %v3432_v33 = vld [vmem:[#allocation2 + $0x368] sm:$0xf0]  ;;  %v2821_v5 = vor.u32 %v3417_v3, %v2820_v31  ;;  %v2801_v25 = vor.u32 %v3412_v22, %v2800_v20  ;;  %v3510_v29 = vld [vmem:[#allocation4 + $0x38] sm:$0xff]  ;;  %v3447_v3 = vld [vmem:[#allocation2 + $0x3e0] sm:$0xf0] }
  0xfb   :  { %1759 = vmatpush.bf16.msra.mxu3 %v2977_v36  ;;  %v2881_v36 = vor.u32 %v3432_v33, %v2880_v30  ;;  %v3160_v30 = vld [vmem:[#allocation2 + $0x588] sm:$0xf]  ;;  %v2780_v33 = vld [vmem:[#allocation2 + $0x290] sm:$0xf] }
  0xfc   :  { %1723 = vmatpush.bf16.msrb.mxu1 %v2617_v40  ;;  %v2680_v40 = vld [vmem:[#allocation2 + $0x1c8] sm:$0xf] }
  0xfd   :  { %1742 = vmatpush.bf16.msrb.mxu2 %v2777_v45  ;;  %1779 = vmatpush.bf16.msra.mxu0 %v3117_v32  ;;  %v2681_v45 = vor.u32 %v3382_v42, %v2680_v40  ;;  %v3502_v32 = vld [vmem:[#allocation2 + $0x598] sm:$0xf0]  ;;  %v3467_v40 = vld [vmem:[#allocation2 + $0x480] sm:$0xf0] }
  0xfe   :  { %1648 = vmatmul.bf16.vlgmr.msra.gmra.mxu1 %v3774_v34  ;;  %v3021_v42 = vor.u32 %v3467_v40, %v3020_v39  ;;  %v3513_v40 = vld [vmem:[#allocation4 + $0x50] sm:$0xff] }
  0xff   :  { %1667 = vmatmul.bf16.vlgmr.msra.gmra.mxu2 %v3798_v44  ;;  %1760 = vmatpush.bf16.msra.mxu3 %v2957_v48  ;;  %v3427_v48 = vld [vmem:[#allocation2 + $0x340] sm:$0xf0] }
 0x100   :  { %1792 = vmatpush.bf16.msra.mxu1 %v2601_v53  ;;  %v2861_v49 = vor.u32 %v3427_v48, %v2860_v15  ;;  %v2501_v53 = vor.u32 %v3337_v28, %v2500_v51  ;;  %v3000_v15 = vld [vmem:[#allocation2 + $0x448] sm:$0xf]  ;;  %v2980_v51 = vld [vmem:[#allocation2 + $0x420] sm:$0xf]  ;;  %v3457_v28 = vld [vmem:[#allocation2 + $0x430] sm:$0xf0] }
 0x101   :  { %1811 = vmatpush.bf16.msra.mxu2 %v2761_v55  ;;  %1780 = vmatpush.bf16.msra.mxu0 %v3097_v47  ;;  %v2661_v55 = vor.u32 %v3377_v54, %v2660_v52  ;;  %v3462_v47 = vld [vmem:[#allocation2 + $0x458] sm:$0xf0]  ;;  %v3497_v54 = vld [vmem:[#allocation2 + $0x570] sm:$0xf0] }
 0x102   :  { %v3001_v48 = vor.u32 %v3462_v47, %v3000_v15 }
 0x103   :  { %1761 = vmatpush.bf16.msra.mxu3 %v2937_v58  ;;  %v3080_v58 = vld [vmem:[#allocation2 + $0x4e8] sm:$0xf] }
 0x104   :  { %1634 = vmatmul.bf16.gmra.mxu0 %v3789_v12  ;;  %1793 = vmatpush.bf16.msra.mxu1 %v2581_v62  ;;  %v3081_v35 = vor.u32 %v3482_v60, %v3080_v58  ;;  %v2480_v62 = vld [vmem:[#allocation2 + $0x38] sm:$0xf]  ;;  %v3507_v58 = vld [vmem:[#allocation4 + $0x20] sm:$0xff] }
 0x105   :  { %1812 = vmatpush.bf16.msra.mxu2 %v2741_v0  ;;  %v2640_v0 = vld [vmem:[#allocation2 + $0x178] sm:$0xf]  ;;  %v2481_v1 = vor.u32 %v3332_v63, %v2480_v62 }
 0x106   :  { %3166 = vmatmul.msk.bf16.vlgmr.msrb.gmra.mxu3 %vm1405_vm1, %v3810_v21  ;;  %v2960_v60 = vld [vmem:[#allocation2 + $0x3f8] sm:$0xf] }
 0x107   :  { %1830 = vmatpush.bf16.msrb.mxu3 %v2921_v2  ;;  %v2641_v2 = vor.u32 %v3372_v61, %v2640_v0  ;;  %v3506_v63 = vld [vmem:[#allocation4 + $0x18] sm:$0xff]  ;;  %v2940_v61 = vld [vmem:[#allocation2 + $0x3d0] sm:$0xf] }
 0x108   :  { %1794 = vmatpush.bf16.msra.mxu1 %v2561_v13  ;;  %v3327_v13 = vld [vmem:[#allocation2 + $0x20] sm:$0xf0]  ;;  %v3120_v0 = vld [vmem:[#allocation2 + $0x538] sm:$0xf]  ;;  %v2941_v7 = vor.u32 %v3447_v3, %v2940_v61 }
 0x109   :  { %1813 = vmatpush.bf16.msra.mxu2 %v2721_v24  ;;  %v2620_v24 = vld [vmem:[#allocation2 + $0x150] sm:$0xf]  ;;  %v2461_v16 = vor.u32 %v3327_v13, %v2460_v11 }
 0x10a   :  { %v2621_v19 = vor.u32 %v3367_v17, %v2620_v24  ;;  %v3505_v11 = vld [vmem:[#allocation4 + $0x10] sm:$0xff]  ;;  %v3487_v17 = vld [vmem:[#allocation2 + $0x520] sm:$0xf0] }
 0x10b   :  { %1831 = vmatpush.bf16.msrb.mxu3 %v2901_v18  ;;  %v3517_v24 = vld [vmem:[#allocation4 + $0x70] sm:$0xff] }
 0x10c   :  { %1795 = vmatpush.bf16.msra.mxu1 %v2541_v23  ;;  %v3040_v23 = vld [vmem:[#allocation2 + $0x498] sm:$0xf] }
 0x10d   :  { %1814 = vmatpush.bf16.msra.mxu2 %v2701_v26  ;;  %v3472_v26 = vld [vmem:[#allocation2 + $0x4a8] sm:$0xf0] }
 0x10e   :  { %1653 = vmatmul.bf16.gmra.mxu1 %v3800_v46  ;;  %v3041_v27 = vor.u32 %v3472_v26, %v3040_v23  ;;  %v3516_v23 = vld [vmem:[#allocation4 + $0x68] sm:$0xff] }
 0x10f   :  { %1672 = vmatmul.bf16.gmra.mxu2 %v3816_v50  ;;  %1832 = vmatpush.bf16.msrb.mxu3 %v2881_v36  ;;  %v3161_v36 = vor.u32 %v3502_v32, %v3160_v30  ;;  %v3515_v30 = vld [vmem:[#allocation4 + $0x60] sm:$0xff] }
 0x110   :  { %1796 = vmatpush.bf16.msra.mxu1 %v2521_v43  ;;  %v2781_v43 = vor.u32 %v3407_v38, %v2780_v33  ;;  %v3514_v33 = vld [vmem:[#allocation4 + $0x58] sm:$0xff] }
 0x111   :  { %1815 = vmatpush.bf16.msra.mxu2 %v2681_v45 }
 0x113   :  { %1833 = vmatpush.bf16.msrb.mxu3 %v2861_v49  ;;  %v3508_v49 = vld [vmem:[#allocation4 + $0x28] sm:$0xff] }
 0x114   :  { %1705 = vmatmul.bf16.vlgmr.msrb.gmra.mxu0 %v3765_v6  ;;  %1797 = vmatpush.bf16.msra.mxu1 %v2501_v53  ;;  %v3140_v53 = vld [vmem:[#allocation2 + $0x560] sm:$0xf] }
 0x115   :  { %1816 = vmatpush.bf16.msra.mxu2 %v2661_v55  ;;  %1849 = vmatpush.bf16.msrb.mxu0 %v3081_v35  ;;  %v2981_v55 = vor.u32 %v3457_v28, %v2980_v51  ;;  %v3141_v56 = vor.u32 %v3497_v54, %v3140_v53  ;;  %v3452_v35 = vld [vmem:[#allocation2 + $0x408] sm:$0xf0] }
 0x116   :  { %3167 = vmatmul.msk.bf16.gmra.mxu3 %vm1405_vm1, %v3823_v14  ;;  %v2961_v62 = vor.u32 %v3452_v35, %v2960_v60 }
 0x117   :  { %1834 = vmatpush.bf16.msrb.mxu3 %v2841_v59 }
 0x118   :  { %1798 = vmatpush.bf16.msra.mxu1 %v2481_v1  ;;  %v3492_v1 = vld [vmem:[#allocation2 + $0x548] sm:$0xf0] }
 0x119   :  { %1817 = vmatpush.bf16.msra.mxu2 %v2641_v2  ;;  %1850 = vmatpush.bf16.msrb.mxu0 %v3061_v8  ;;  %v3121_v31 = vor.u32 %v3492_v1, %v3120_v0  ;;  %v3525_v0 = vld [vmem:[#allocation4 + $0xb0] sm:$0xff] }
 0x11b   :  { %v3850_v18 = vpop.f32.mrf.mxu1  ;;  %1835 = vmatpush.bf16.msrb.mxu3 %v2821_v5 }
 0x11c   :  { %1799 = vmatpush.bf16.msra.mxu1 %v2461_v16  ;;  %v3100_v16 = vld [vmem:[#allocation2 + $0x510] sm:$0xf] }
 0x11d   :  { %1818 = vmatpush.bf16.msra.mxu2 %v2621_v19  ;;  %1851 = vmatpush.bf16.msrb.mxu0 %v3041_v27  ;;  %v3504_v19 = vld [vmem:[#allocation4 + $0x8] sm:$0xff]  ;;  %v3101_v20 = vor.u32 %v3487_v17, %v3100_v16  ;;  %v3503_v27 = vld [vmem:[#allocation4] sm:$0xff] }
 0x11e   :  { %1724 = vmatmul.bf16.vlgmr.msrb.gmra.mxu1 %v3767_v10  ;;  %v3523_v16 = vld [vmem:[#allocation4 + $0xa0] sm:$0xff] }
 0x11f   :  { %1743 = vmatmul.bf16.vlgmr.msrb.gmra.mxu2 %v3774_v34  ;;  %1836 = vmatpush.bf16.msrb.mxu3 %v2801_v25 }
 0x120   :  { %1872 = vmatpush.bf16.msrb.mxu1 %v3161_v36 }
 0x121   :  { %2215 = vmatpush.bf16.msrb.mxu2 %v3510_v29  ;;  %1852 = vmatpush.bf16.msrb.mxu0 %v3021_v42 }
 0x122   :  { %v3854_v45 = vpop.f32.mrf.mxu2 }
 0x123   :  { %v3856_v41 = vpop.f32.mrf.mxu1  ;;  %1837 = vmatpush.bf16.msrb.mxu3 %v2781_v43  ;;  %v3512_v43 = vld [vmem:[#allocation4 + $0x48] sm:$0xff] }
 0x124   :  { %1710 = vmatmul.bf16.gmra.mxu0 %v3787_v9  ;;  %1873 = vmatpush.bf16.msrb.mxu1 %v3141_v56 }
 0x125   :  { %2216 = vmatpush.bf16.msrb.mxu2 %v3509_v37  ;;  %1853 = vmatpush.bf16.msrb.mxu0 %v3001_v48  ;;  %v3511_v48 = vld [vmem:[#allocation4 + $0x40] sm:$0xff] }
 0x126   :  { %1762 = vmatmul.bf16.vlgmr.msra.gmra.mxu3 %v3798_v44 }
 0x127   :  { %2234 = vmatpush.bf16.msra.mxu3 %v3518_v4 }
 0x128   :  { %1874 = vmatpush.bf16.msrb.mxu1 %v3121_v31 }
 0x129   :  { %v3860_v52 = vpop.f32.mrf.mxu3  ;;  %2217 = vmatpush.bf16.msrb.mxu2 %v3508_v49  ;;  %1854 = vmatpush.bf16.msrb.mxu0 %v2981_v55 }
 0x12a   :  { %v3862_v57 = vpop.f32.mrf.mxu2 }
 0x12b   :  { %v3864_v59 = vpop.f32.mrf.mxu1  ;;  %2235 = vmatpush.bf16.msra.mxu3 %v3517_v24 }
 0x12c   :  { %1875 = vmatpush.bf16.msrb.mxu1 %v3101_v20 }
 0x12d   :  { %2218 = vmatpush.bf16.msrb.mxu2 %v3507_v58  ;;  %1855 = vmatpush.bf16.msrb.mxu0 %v2961_v62 }
 0x12e   :  { %1729 = vmatmul.bf16.gmra.mxu1 %v3789_v12 }
 0x12f   :  { %1748 = vmatmul.bf16.gmra.mxu2 %v3800_v46  ;;  %2236 = vmatpush.bf16.msra.mxu3 %v3516_v23 }
 0x131   :  { %v3868_v2 = vpop.f32.mrf.mxu3  ;;  %v3870_v5 = vpop.f32.mrf.mxu0  ;;  %2219 = vmatpush.bf16.msrb.mxu2 %v3506_v63  ;;  %1856 = vmatpush.bf16.msrb.mxu0 %v2941_v7 }
 0x132   :  { %v3872_v8 = vpop.f32.mrf.mxu2 }
 0x133   :  { %v3874_v13 = vpop.f32.mrf.mxu1  ;;  %2237 = vmatpush.bf16.msra.mxu3 %v3515_v30 }
 0x134   :  { %3168 = vmatmul.msk.bf16.vlgmr.msra.gmra.mxu0 %vm1405_vm1, %v3810_v21 }
 0x135   :  { %2220 = vmatpush.bf16.msrb.mxu2 %v3505_v11 }
 0x136   :  { %1767 = vmatmul.bf16.gmra.mxu3 %v3816_v50 }
 0x137   :  { %2238 = vmatpush.bf16.msra.mxu3 %v3514_v33 }
 0x139   :  { %v3879_v22 = vpop.f32.mrf.mxu3  ;;  %v1480_v25 = vpop.f32.mrf.mxu0  ;;  %2221 = vmatpush.bf16.msrb.mxu2 %v3504_v19 }
 0x13a   :  { %v3881_v26 = vpop.f32.mrf.mxu2 }
 0x13b   :  { %v1497_v29 = vpop.f32.mrf.mxu1  ;;  %2239 = vmatpush.bf16.msra.mxu3 %v3513_v40 }
 0x13d   :  { %2222 = vmatpush.bf16.msrb.mxu2 %v3503_v27 }
 0x13e   :  { %1800 = vmatmul.bf16.vlgmr.msra.gmra.mxu1 %v3765_v6  ;;  %v3893_v6 = vld [vmem:[%s3954_s4] sm:$0x1f] }
 0x13f   :  { %1819 = vmatmul.bf16.vlgmr.msra.gmra.mxu2 %v3767_v10  ;;  %2240 = vmatpush.bf16.msra.mxu3 %v3512_v43  ;;  %v459_v15 = vperm.slane %v3893_v6, 0  ;;  %v460_v61 = vperm.slane %v3893_v6, 1  ;;  %v3521_v43 = vld [vmem:[#allocation4 + $0x90] sm:$0xff] }
 0x141   :  { %v1466_v32 = vpop.f32.mrf.mxu3  ;;  %v3885_v36 = vpop.f32.mrf.mxu0  ;;  %v1424_v49 = vadd.f32 %v3856_v41, %v459_v15  ;;  %v1427_v31 = vadd.f32 %v3864_v59, %v459_v15 }
 0x142   :  { %v1516_v38 = vpop.f32.mrf.mxu2 }
 0x143   :  { %v1499_v39 = vpop.f32.mrf.mxu1  ;;  %2241 = vmatpush.bf16.msra.mxu3 %v3511_v48  ;;  %v1443_v51 = vadd.f32 %v3862_v57, %v1424_v49  ;;  %v1517_v11 = vadd.f32 %v1516_v38, %v460_v61 }
 0x144   :  { %3169 = vmatmul.msk.bf16.gmra.mxu0 %vm1405_vm1, %v3823_v14 }
 0x145   :  { %v1462_v54 = vadd.f32 %v3868_v2, %v1443_v51 }
 0x146   :  { %1838 = vmatmul.bf16.vlgmr.msrb.gmra.mxu3 %v3774_v34  ;;  %v1422_v34 = vadd.f32 %v3850_v18, %v459_v15 }
 0x147   :  { %v1481_v41 = vadd.f32 %v1480_v25, %v1462_v54  ;;  %v3519_v54 = vld [vmem:[#allocation4 + $0x80] sm:$0xff] }
 0x148   :  { %v1441_v53 = vadd.f32 %v3854_v45, %v1422_v34 }
 0x149   :  { %v1535_v10 = vpop.f32.mrf.mxu3  ;;  %v1485_v42 = vpop.f32.mrf.mxu0  ;;  %v1500_v18 = vadd.f32 %v1499_v39, %v1481_v41 }
 0x14a   :  { %v1518_v37 = vpop.f32.mrf.mxu2  ;;  %v1460_v58 = vadd.f32 %v3860_v52, %v1441_v53  ;;  %v1536_v19 = vadd.f32 %v1535_v10, %v1517_v11  ;;  %v3532_v11 = vld [vmem:[#allocation4 + $0xe8] sm:$0xff] }
 0x14b   :  { %v1502_v47 = vpop.f32.mrf.mxu1  ;;  %v1892_v45 = vmax.f32 %v1500_v18, 0.0 }
 0x14e   :  { %1805 = vmatmul.bf16.gmra.mxu1 %v3787_v9  ;;  %v1479_v9 = vadd.f32 %v3870_v5, %v1460_v58  ;;  %v1446_v5 = vadd.f32 %v3872_v8, %v1427_v31  ;;  %v3522_v8 = vld [vmem:[#allocation4 + $0x98] sm:$0xff]  ;;  %v461_v31 = vperm.slane %v3893_v6, 2 }
 0x14f   :  { %1824 = vmatmul.bf16.gmra.mxu2 %v3789_v12  ;;  %v3526_v12 = vld [vmem:[#allocation4 + $0xb8] sm:$0xff] }
 0x150   :  { %v1498_v57 = vadd.f32 %v1497_v29, %v1479_v9  ;;  %2253 = vmatpush.bf16.msra.mxu0 %v3526_v12  ;;  %v1465_v17 = vadd.f32 %v3879_v22, %v1446_v5 }
 0x151   :  { %v1537_v28 = vpop.f32.mrf.mxu3  ;;  %v1554_v55 = vpop.f32.mrf.mxu0 }
 0x152   :  { %v3903_v56 = vpop.f32.mrf.mxu2  ;;  %v1887_v52 = vmax.f32 %v1498_v57, 0.0  ;;  %v1484_v59 = vadd.f32 %v3885_v36, %v1465_v17 }
 0x153   :  { %v1504_v60 = vpop.f32.mrf.mxu1  ;;  %v1522_v51 = vadd.f32 %v3903_v56, %v460_v61 }
 0x154   :  { %1857 = vmatmul.bf16.vlgmr.msrb.gmra.mxu0 %v3798_v44  ;;  %v1429_v44 = vadd.f32 %v3874_v13, %v459_v15  ;;  %v1907_v2 = vpack.c.bf16 %v1892_v45, %v1887_v52  ;;  %v1503_v29 = vadd.f32 %v1502_v47, %v1484_v59  ;;  %v3520_v47 = vld [vmem:[#allocation4 + $0x88] sm:$0xff] }
 0x155   :  { %2254 = vmatpush.bf16.msra.mxu0 %v3525_v0 }
 0x156   :  { %1843 = vmatmul.bf16.gmra.mxu3 %v3800_v46  ;;  %v3524_v46 = vld [vmem:[#allocation4 + $0xa8] sm:$0xff]  ;;  %v1448_v3 = vadd.f32 %v3881_v26, %v1429_v44  ;;  %v1555_v26 = vadd.f32 %v1554_v55, %v1536_v19 }
 0x158   :  { %v1467_v7 = vadd.f32 %v1466_v32, %v1448_v3 }
 0x159   :  { %v3909_v35 = vpop.f32.mrf.mxu3  ;;  %v1556_v62 = vpop.f32.mrf.mxu0  ;;  %2255 = vmatpush.bf16.msra.mxu0 %v3524_v46 }
 0x15a   :  { %v3911_v63 = vpop.f32.mrf.mxu2  ;;  %v1486_v20 = vadd.f32 %v1485_v42, %v1467_v7  ;;  %v1897_v42 = vmax.f32 %v1503_v29, 0.0  ;;  %v1541_v55 = vadd.f32 %v3909_v35, %v1522_v51  ;;  %v3534_v35 = vld [vmem:[#allocation4 + $0xf8] sm:$0xff]  ;;  %v3527_v51 = vld [vmem:[#allocation4 + $0xc0] sm:$0xff] }
 0x15b   :  { %v1573_v1 = vpop.f32.mrf.mxu1  ;;  %v1524_v58 = vadd.f32 %v3911_v63, %v460_v61  ;;  %2272 = vmatpush.bf16.msra.mxu1 %v3534_v35  ;;  %v3530_v29 = vld [vmem:[#allocation4 + $0xd8] sm:$0xff] }
 0x15c   :  { %v1505_v27 = vadd.f32 %v1504_v60, %v1486_v20  ;;  %v1574_v32 = vadd.f32 %v1573_v1, %v1555_v26 }
 0x15d   :  { %2256 = vmatpush.bf16.msra.mxu0 %v3523_v16 }
 0x15e   :  { %3170 = vmatmul.msk.bf16.vlgmr.msrb.gmra.mxu1 %vm1405_vm1, %v3810_v21  ;;  %v1519_v21 = vadd.f32 %v1518_v37, %v460_v61  ;;  %v1902_v38 = vmax.f32 %v1505_v27, 0.0 }
 0x15f   :  { %2223 = vmatmul.bf16.vlgmr.msrb.gmra.mxu2 %v1907_v2 }
 0x160   :  { %v1538_v25 = vadd.f32 %v1537_v28, %v1519_v21  ;;  %v1912_v48 = vpack.c.bf16 %v1902_v38, %v1897_v42 }
 0x161   :  { %v1542_v4 = vpop.f32.mrf.mxu3  ;;  %v1559_v24 = vpop.f32.mrf.mxu0  ;;  %2257 = vmatpush.bf16.msra.mxu0 %v3522_v8 }
 0x162   :  { %v1592_v13 = vpop.f32.mrf.mxu2  ;;  %v1557_v30 = vadd.f32 %v1556_v62, %v1538_v25  ;;  %v1543_v60 = vadd.f32 %v1542_v4, %v1524_v58  ;;  %v1560_v9 = vadd.f32 %v1559_v24, %v1541_v55  ;;  %v3533_v4 = vld [vmem:[#allocation4 + $0xf0] sm:$0xff] }
 0x163   :  { %v1575_v23 = vpop.f32.mrf.mxu1  ;;  %v1593_v39 = vadd.f32 %v1592_v13, %v1574_v32  ;;  %2273 = vmatpush.bf16.msra.mxu1 %v3533_v4 }
 0x164   :  { %1862 = vmatmul.bf16.gmra.mxu0 %v3816_v50  ;;  %v1576_v22 = vadd.f32 %v1575_v23, %v1557_v30  ;;  %v3531_v23 = vld [vmem:[#allocation4 + $0xe0] sm:$0xff] }
 0x165   :  { %v1888_v36 = vmax.f32 %v1593_v39, 0.0  ;;  %2258 = vmatpush.bf16.msra.mxu0 %v3521_v43 }
 0x167   :  { %2274 = vmatpush.bf16.msra.mxu1 %v3532_v11 }
 0x169   :  { %v1611_v33 = vpop.f32.mrf.mxu3  ;;  %v1561_v40 = vpop.f32.mrf.mxu0  ;;  %2259 = vmatpush.bf16.msra.mxu0 %v3520_v47 }
 0x16a   :  { %v1594_v10 = vpop.f32.mrf.mxu2  ;;  %v1612_v5 = vadd.f32 %v1611_v33, %v461_v31 }
 0x16b   :  { %v1595_v50 = vadd.f32 %v1594_v10, %v1576_v22  ;;  %v1578_v37 = vpop.f32.mrf.mxu1  ;;  %2275 = vmatpush.bf16.msra.mxu1 %v3531_v23 }
 0x16c   :  { %v1579_v18 = vadd.f32 %v1578_v37, %v1560_v9 }
 0x16d   :  { %v1893_v15 = vmax.f32 %v1595_v50, 0.0  ;;  %2260 = vmatpush.bf16.msra.mxu0 %v3519_v54  ;;  %v3528_v50 = vld [vmem:[#allocation4 + $0xc8] sm:$0xff] }
 0x16e   :  { %3171 = vmatmul.msk.bf16.gmra.mxu1 %vm1405_vm1, %v3823_v14  ;;  %v1562_v14 = vadd.f32 %v1561_v40, %v1543_v60  ;;  %v3529_v40 = vld [vmem:[#allocation4 + $0xd0] sm:$0xff] }
 0x16f   :  { %v1908_v49 = vpack.c.bf16 %v1893_v15, %v1888_v36  ;;  %2228 = vmatmul.bf16.gmra.mxu2 %v1912_v48  ;;  %2276 = vmatpush.bf16.msra.mxu1 %v3530_v29 }
 0x171   :  { %v1613_v34 = vpop.f32.mrf.mxu3  ;;  %2242 = vmatmul.bf16.vlgmr.msra.gmra.mxu3 %v1908_v49  ;;  %v1630_v28 = vpop.f32.mrf.mxu0 }
 0x172   :  { %v1597_v53 = vpop.f32.mrf.mxu2  ;;  %v1614_v24 = vadd.f32 %v1613_v34, %v461_v31  ;;  %v1631_v13 = vadd.f32 %v1630_v28, %v1612_v5 }
 0x173   :  { %v1580_v41 = vpop.f32.mrf.mxu1  ;;  %v1598_v57 = vadd.f32 %v1597_v53, %v1579_v18  ;;  %2277 = vmatpush.bf16.msra.mxu1 %v3529_v40 }
 0x174   :  { %v1581_v45 = vadd.f32 %v1580_v41, %v1562_v14 }
 0x175   :  { %v1898_v1 = vmax.f32 %v1598_v57, 0.0 }
 0x177   :  { %2278 = vmatpush.bf16.msra.mxu1 %v3528_v50 }
 0x179   :  { %v1616_v12 = vpop.f32.mrf.mxu3  ;;  %v1632_v62 = vpop.f32.mrf.mxu0 }
 0x17a   :  { %v1599_v56 = vpop.f32.mrf.mxu2  ;;  %v1633_v19 = vadd.f32 %v1632_v62, %v1614_v24  ;;  %v1617_v43 = vadd.f32 %v1616_v12, %v461_v31 }
 0x17b   :  { %v1600_v0 = vadd.f32 %v1599_v56, %v1581_v45  ;;  %v1649_v52 = vpop.f32.mrf.mxu1  ;;  %2279 = vmatpush.bf16.msra.mxu1 %v3527_v51 }
 0x17c   :  { %v1650_v20 = vadd.f32 %v1649_v52, %v1631_v13  ;;  %v3538_v52 = vld [vmem:[#allocation4 + $0x118] sm:$0xff] }
 0x17d   :  { %v1903_v44 = vmax.f32 %v1600_v0, 0.0  ;;  %v462_v0 = vperm.slane %v3893_v6, 3  ;;  %2295 = vmatpush.bf16.msra.mxu2 %v3538_v52 }
 0x17f   :  { %v1913_v2 = vpack.c.bf16 %v1903_v44, %v1898_v1 }
 0x181   :  { %v1618_v46 = vpop.f32.mrf.mxu3  ;;  %2247 = vmatmul.bf16.gmra.mxu3 %v1913_v2  ;;  %v1635_v63 = vpop.f32.mrf.mxu0 }
 0x182   :  { %v1668_v61 = vpop.f32.mrf.mxu2  ;;  %v1619_v37 = vadd.f32 %v1618_v46, %v461_v31  ;;  %v1636_v36 = vadd.f32 %v1635_v63, %v1617_v43  ;;  %v3537_v31 = vld [vmem:[#allocation4 + $0x110] sm:$0xff] }
 0x183   :  { %v1651_v3 = vpop.f32.mrf.mxu1  ;;  %v1669_v59 = vadd.f32 %v1668_v61, %v1650_v20  ;;  %2296 = vmatpush.bf16.msra.mxu2 %v3537_v31 }
 0x184   :  { %v1652_v25 = vadd.f32 %v1651_v3, %v1633_v19 }
 0x189   :  { %v1687_v7 = vpop.f32.mrf.mxu3  ;;  %v1637_v16 = vpop.f32.mrf.mxu0 }
 0x18a   :  { %v1670_v17 = vpop.f32.mrf.mxu2  ;;  %v1688_v26 = vadd.f32 %v1687_v7, %v1669_v59  ;;  %v1638_v48 = vadd.f32 %v1637_v16, %v1619_v37 }
 0x18b   :  { %v1654_v21 = vpop.f32.mrf.mxu1  ;;  %v1671_v27 = vadd.f32 %v1670_v17, %v1652_v25 }
 0x18c   :  { %v1889_v38 = vmax.f32 %v1688_v26, 0.0  ;;  %v1655_v47 = vadd.f32 %v1654_v21, %v1636_v36  ;;  %v3536_v21 = vld [vmem:[#allocation4 + $0x108] sm:$0xff] }
 0x18d   :  { %2297 = vmatpush.bf16.msra.mxu2 %v3536_v21 }
 0x191   :  { %v1689_v8 = vpop.f32.mrf.mxu3  ;;  %v1706_v32 = vpop.f32.mrf.mxu0 }
 0x192   :  { %v1690_v30 = vadd.f32 %v1689_v8, %v1671_v27  ;;  %v1673_v33 = vpop.f32.mrf.mxu2  ;;  %v1707_v44 = vadd.f32 %v1706_v32, %v462_v0 }
 0x193   :  { %v1656_v22 = vpop.f32.mrf.mxu1  ;;  %v1674_v28 = vadd.f32 %v1673_v33, %v1655_v47  ;;  %v3535_v33 = vld [vmem:[#allocation4 + $0x100] sm:$0xff] }
 0x194   :  { %v1894_v39 = vmax.f32 %v1690_v30, 0.0  ;;  %v1657_v53 = vadd.f32 %v1656_v22, %v1638_v48  ;;  %2298 = vmatpush.bf16.msra.mxu2 %v3535_v33 }
 0x196   :  { %v1909_v10 = vpack.c.bf16 %v1894_v39, %v1889_v38 }
 0x198   :  { %2261 = vmatmul.bf16.vlgmr.msra.gmra.mxu0 %v1909_v10 }
 0x199   :  { %v1692_v42 = vpop.f32.mrf.mxu3  ;;  %v1708_v15 = vpop.f32.mrf.mxu0 }
 0x19a   :  { %v1675_v49 = vpop.f32.mrf.mxu2  ;;  %v1693_v54 = vadd.f32 %v1692_v42, %v1674_v28  ;;  %v1709_v35 = vadd.f32 %v1708_v15, %v462_v0 }
 0x19b   :  { %v1725_v34 = vpop.f32.mrf.mxu1  ;;  %v1676_v55 = vadd.f32 %v1675_v49, %v1657_v53  ;;  %v463_v53 = vperm.slane %v3893_v6, 4 }
 0x19c   :  { %v1899_v9 = vmax.f32 %v1693_v54, 0.0  ;;  %v1726_v63 = vadd.f32 %v1725_v34, %v1707_v44 }
 0x1a1   :  { %v1694_v58 = vpop.f32.mrf.mxu3  ;;  %v1711_v60 = vpop.f32.mrf.mxu0 }
 0x1a2   :  { %v1695_v41 = vadd.f32 %v1694_v58, %v1676_v55  ;;  %v1744_v57 = vpop.f32.mrf.mxu2  ;;  %v1712_v26 = vadd.f32 %v1711_v60, %v462_v0 }
 0x1a3   :  { %v1727_v18 = vpop.f32.mrf.mxu1  ;;  %v1745_v3 = vadd.f32 %v1744_v57, %v1726_v63 }
 0x1a4   :  { %v1904_v14 = vmax.f32 %v1695_v41, 0.0  ;;  %v1728_v4 = vadd.f32 %v1727_v18, %v1709_v35 }
 0x1a6   :  { %v1914_v12 = vpack.c.bf16 %v1904_v14, %v1899_v9 }
 0x1a8   :  { %2266 = vmatmul.bf16.gmra.mxu0 %v1914_v12 }
 0x1a9   :  { %v1763_v45 = vpop.f32.mrf.mxu3  ;;  %v1713_v62 = vpop.f32.mrf.mxu0 }
 0x1aa   :  { %v1746_v1 = vpop.f32.mrf.mxu2  ;;  %v1764_v5 = vadd.f32 %v1763_v45, %v1745_v3  ;;  %v1714_v8 = vadd.f32 %v1713_v62, %v462_v0 }
 0x1ab   :  { %v1730_v56 = vpop.f32.mrf.mxu1  ;;  %v1747_v7 = vadd.f32 %v1746_v1, %v1728_v4 }
 0x1ac   :  { %v1731_v29 = vadd.f32 %v1730_v56, %v1712_v26 }
 0x1b1   :  { %v1765_v2 = vpop.f32.mrf.mxu3  ;;  %v1782_v46 = vpop.f32.mrf.mxu0 }
 0x1b2   :  { %v1766_v11 = vadd.f32 %v1765_v2, %v1747_v7  ;;  %v1783_v24 = vadd.f32 %v1782_v46, %v1764_v5  ;;  %v1749_v13 = vpop.f32.mrf.mxu2 }
 0x1b3   :  { %v1732_v61 = vpop.f32.mrf.mxu1  ;;  %v1750_v38 = vadd.f32 %v1749_v13, %v1731_v29 }
 0x1b4   :  { %v1890_v23 = vmax.f32 %v1783_v24, 0.0  ;;  %v1733_v39 = vadd.f32 %v1732_v61, %v1714_v8 }
 0x1b9   :  { %v1784_v16 = vpop.f32.mrf.mxu0  ;;  %v1768_v19 = vpop.f32.mrf.mxu3 }
 0x1ba   :  { %v1785_v17 = vadd.f32 %v1784_v16, %v1766_v11  ;;  %v1751_v30 = vpop.f32.mrf.mxu2  ;;  %v1769_v40 = vadd.f32 %v1768_v19, %v1750_v38 }
 0x1bb   :  { %v1801_v20 = vpop.f32.mrf.mxu1  ;;  %v1752_v10 = vadd.f32 %v1751_v30, %v1733_v39 }
 0x1bc   :  { %v1895_v59 = vmax.f32 %v1785_v17, 0.0  ;;  %v1802_v58 = vadd.f32 %v1801_v20, %v463_v53 }
 0x1be   :  { %v1910_v25 = vpack.c.bf16 %v1895_v59, %v1890_v23 }
 0x1c0   :  { %2280 = vmatmul.bf16.vlgmr.msra.gmra.mxu1 %v1910_v25 }
 0x1c1   :  { %v1787_v27 = vpop.f32.mrf.mxu0  ;;  %v1770_v22 = vpop.f32.mrf.mxu3 }
 0x1c2   :  { %v1771_v43 = vadd.f32 %v1770_v22, %v1752_v10  ;;  %v1788_v42 = vadd.f32 %v1787_v27, %v1769_v40  ;;  %v1820_v47 = vpop.f32.mrf.mxu2 }
 0x1c3   :  { %v1803_v32 = vpop.f32.mrf.mxu1  ;;  %v1821_v9 = vadd.f32 %v1820_v47, %v1802_v58 }
 0x1c4   :  { %v1900_v15 = vmax.f32 %v1788_v42, 0.0  ;;  %v1804_v14 = vadd.f32 %v1803_v32, %v463_v53  ;;  %v3557_v32 = vld [vmem:[%s3956_s6] ss:$0 sm:$0xff] }
 0x1c9   :  { %v1789_v50 = vpop.f32.mrf.mxu0  ;;  %v1839_v34 = vpop.f32.mrf.mxu3 }
 0x1ca   :  { %v1790_v37 = vadd.f32 %v1789_v50, %v1771_v43  ;;  %v1822_v54 = vpop.f32.mrf.mxu2  ;;  %v1840_v18 = vadd.f32 %v1839_v34, %v1821_v9 }
 0x1cb   :  { %v1806_v36 = vpop.f32.mrf.mxu1  ;;  %v1823_v12 = vadd.f32 %v1822_v54, %v1804_v14 }
 0x1cc   :  { %v1905_v48 = vmax.f32 %v1790_v37, 0.0  ;;  %v1807_v63 = vadd.f32 %v1806_v36, %v463_v53 }
 0x1ce   :  { %v1915_v49 = vpack.c.bf16 %v1905_v48, %v1900_v15 }
 0x1d0   :  { %2285 = vmatmul.bf16.gmra.mxu1 %v1915_v49 }
 0x1d1   :  { %v1858_v51 = vpop.f32.mrf.mxu0  ;;  %v1841_v55 = vpop.f32.mrf.mxu3 }
 0x1d2   :  { %v1842_v57 = vadd.f32 %v1841_v55, %v1823_v12  ;;  %v1859_v45 = vadd.f32 %v1858_v51, %v1840_v18  ;;  %v1825_v62 = vpop.f32.mrf.mxu2 }
 0x1d3   :  { %v1808_v28 = vpop.f32.mrf.mxu1  ;;  %v1826_v3 = vadd.f32 %v1825_v62, %v1807_v63 }
 0x1d4   :  { %v1809_v4 = vadd.f32 %v1808_v28, %v463_v53 }
 0x1d9   :  { %v1860_v41 = vpop.f32.mrf.mxu0  ;;  %v1844_v52 = vpop.f32.mrf.mxu3 }
 0x1da   :  { %v1861_v56 = vadd.f32 %v1860_v41, %v1842_v57  ;;  %v1827_v61 = vpop.f32.mrf.mxu2  ;;  %v1845_v7 = vadd.f32 %v1844_v52, %v1826_v3 }
 0x1db   :  { %v1877_v60 = vpop.f32.mrf.mxu1  ;;  %v1828_v11 = vadd.f32 %v1827_v61, %v1809_v4 }
 0x1dc   :  { %v1878_v0 = vadd.f32 %v1877_v60, %v1859_v45 }
 0x1de   :  { %v1891_v46 = vmax.f32 %v1878_v0, 0.0 }
 0x1e1   :  { %v1863_v2 = vpop.f32.mrf.mxu0  ;;  %v1846_v5 = vpop.f32.mrf.mxu3 }
 0x1e2   :  { %v1847_v13 = vadd.f32 %v1846_v5, %v1828_v11  ;;  %v1864_v16 = vadd.f32 %v1863_v2, %v1845_v7  ;;  %v2224_v26 = vpop.f32.mrf.mxu2 }
 0x1e3   :  { %v1879_v1 = vpop.f32.mrf.mxu1  ;;  %v2225_v39 = vadd.f32 %v3557_v32, %v2224_v26 }
 0x1e4   :  { %v1880_v44 = vadd.f32 %v1879_v1, %v1861_v56 }
 0x1e6   :  { %v1896_v6 = vmax.f32 %v1880_v44, 0.0 }
 0x1e8   :  { %v1911_v35 = vpack.c.bf16 %v1896_v6, %v1891_v46 }
 0x1e9   :  { %v1865_v24 = vpop.f32.mrf.mxu0 }
 0x1ea   :  { %3316 = vmatmul.msk.bf16.vlgmr.msra.gmra.mxu2 %vm1405_vm1, %v1911_v35  ;;  %v1866_v17 = vadd.f32 %v1865_v24, %v1847_v13  ;;  %v2226_v27 = vpop.f32.mrf.mxu2 }
 0x1eb   :  { %v1882_v31 = vpop.f32.mrf.mxu1  ;;  %v2227_v36 = vadd.f32 %v3557_v32, %v2226_v27 }
 0x1ec   :  { %v1883_v19 = vadd.f32 %v1882_v31, %v1864_v16 }
 0x1ee   :  { %v1901_v23 = vmax.f32 %v1883_v19, 0.0 }
 0x1f2   :  { %v2229_v8 = vpop.f32.mrf.mxu2 }
 0x1f3   :  { %v1884_v20 = vpop.f32.mrf.mxu1  ;;  %v2230_v53 = vadd.f32 %v3557_v32, %v2229_v8 }
 0x1f4   :  { %v1885_v21 = vadd.f32 %v1884_v20, %v1866_v17  ;;  %v2243_v29 = vpop.f32.mrf.mxu3 }
 0x1f5   :  { %v2244_v22 = vadd.f32 %v2243_v29, %v2225_v39 }
 0x1f6   :  { %v1906_v59 = vmax.f32 %v1885_v21, 0.0 }
 0x1f8   :  { %v1916_v25 = vpack.c.bf16 %v1906_v59, %v1901_v23 }
 0x1fa   :  { %3317 = vmatmul.msk.bf16.gmra.mxu2 %vm1405_vm1, %v1916_v25  ;;  %v2231_v38 = vpop.f32.mrf.mxu2 }
 0x1fb   :  { %v2232_v18 = vadd.f32 %v3557_v32, %v2231_v38 }
 0x1fc   :  { %v2245_v40 = vpop.f32.mrf.mxu3 }
 0x1fd   :  { %v2246_v48 = vadd.f32 %v2245_v40, %v2227_v36 }
 0x204   :  { %v2248_v49 = vpop.f32.mrf.mxu3 }
 0x205   :  { %v2249_v58 = vadd.f32 %v2248_v49, %v2230_v53 }
 0x20c   :  { %v2250_v9 = vpop.f32.mrf.mxu3 }
 0x20d   :  { %v2251_v45 = vadd.f32 %v2250_v9, %v2232_v18 }
 0x215   :  { %v2262_v30 = vpop.f32.mrf.mxu0 }
 0x216   :  { %v2263_v10 = vadd.f32 %v2262_v30, %v2244_v22 }
 0x21d   :  { %v2264_v43 = vpop.f32.mrf.mxu0 }
 0x21e   :  { %v2265_v47 = vadd.f32 %v2264_v43, %v2246_v48 }
 0x225   :  { %v2267_v51 = vpop.f32.mrf.mxu0 }
 0x226   :  { %v2268_v41 = vadd.f32 %v2267_v51, %v2249_v58 }
 0x22d   :  { %v2269_v57 = vpop.f32.mrf.mxu0 }
 0x22e   :  { %v2270_v56 = vadd.f32 %v2269_v57, %v2251_v45 }
 0x23d   :  { %v2281_v33 = vpop.f32.mrf.mxu1 }
 0x23e   :  { %v2282_v42 = vadd.f32 %v2281_v33, %v2263_v10 }
 0x245   :  { %v2283_v50 = vpop.f32.mrf.mxu1 }
 0x246   :  { %v2284_v34 = vadd.f32 %v2283_v50, %v2265_v47 }
 0x24d   :  { %v2286_v55 = vpop.f32.mrf.mxu1 }
 0x24e   :  { %v2287_v60 = vadd.f32 %v2286_v55, %v2268_v41 }
 0x255   :  { %v2288_v62 = vpop.f32.mrf.mxu1 }
 0x256   :  { %v2289_v0 = vadd.f32 %v2288_v62, %v2270_v56 }
 0x26d   :  { %v2300_v37 = vpop.f32.mrf.mxu2 }
 0x26e   :  { %v2301_v15 = vadd.f32 %v2300_v37, %v2282_v42 }
 0x270   :  { %2310 = vmax.xlane.f32.xlu0 %v2301_v15 }
 0x275   :  { %v2302_v28 = vpop.f32.mrf.mxu2 }
 0x276   :  { %v2303_v54 = vadd.f32 %v2302_v28, %v2284_v34 }
 0x278   :  { %2312 = vmax.xlane.f32.xlu0 %v2303_v54 }
 0x27d   :  { %v2305_v14 = vpop.f32.mrf.mxu2 }
 0x27e   :  { %v2306_v12 = vadd.f32 %v2305_v14, %v2287_v60 }
 0x280   :  { %2314 = vmax.xlane.f32.xlu1 %v2306_v12 }
 0x285   :  { %v2307_v52 = vpop.f32.mrf.mxu2 }
 0x286   :  { %v2308_v1 = vadd.f32 %v2307_v52, %v2289_v0 }
 0x288   :  { %2316 = vmax.xlane.f32.xlu1 %v2308_v1 }
 0x2e3   :  { %v2311_v44 = vpop.xlane.xlu0 %2310 }
 0x2e4   :  { %v2318_v2 = vsub.f32 %v2301_v15, %v2311_v44 }
 0x2e6   :  { %v2322_v46 = vmul.f32 1.442695, %v2318_v2 }
 0x2e8   :  { %3558 = vpow2.f32 %v2322_v46 }
 0x2eb   :  { %v2313_v6 = vpop.xlane.xlu0 %2312 }
 0x2ec   :  { %v2319_v35 = vsub.f32 %v2303_v54, %v2313_v6 }
 0x2ee   :  { %v3559_v63 = vpop.eup %3558  ;;  %v2324_v61 = vmul.f32 1.442695, %v2319_v35 }
 0x2ef   :  { %2330 = vadd.xlane.f32.xlu2 %v3559_v63 }
 0x2f0   :  { %3560 = vpow2.f32 %v2324_v61 }
 0x2f3   :  { %v2315_v31 = vpop.xlane.xlu1 %2314 }
 0x2f4   :  { %v2320_v3 = vsub.f32 %v2306_v12, %v2315_v31 }
 0x2f6   :  { %v3561_v4 = vpop.eup %3560  ;;  %v2326_v5 = vmul.f32 1.442695, %v2320_v3 }
 0x2f7   :  { %2332 = vadd.xlane.f32.xlu2 %v3561_v4 }
 0x2f8   :  { %3562 = vpow2.f32 %v2326_v5 }
 0x2fb   :  { %v2317_v7 = vpop.xlane.xlu1 %2316 }
 0x2fc   :  { %v2321_v11 = vsub.f32 %v2308_v1, %v2317_v7 }
 0x2fe   :  { %v3936_v24 = vpop.eup %3562  ;;  %v2328_v13 = vmul.f32 1.442695, %v2321_v11 }
 0x2ff   :  { %2334 = vadd.xlane.f32.xlu0 %v3936_v24 }
 0x300   :  { %3564 = vpow2.f32 %v2328_v13 }
 0x306   :  { %v3939_v16 = vpop.eup %3564 }
 0x307   :  { %2336 = vadd.xlane.f32.xlu1 %v3939_v16 }
 0x362   :  { %v2331_v17 = vpop.xlane.xlu2 %2330 }
 0x363   :  { %3566 = vrcp.f32 %v2331_v17  ;;  %v2349_v29 = vand.u32 2147483648, %v2331_v17  ;;  %vm2343_vm3 = vweird.f32 %v2331_v17  ;;  %v2347_v30 = vand.u32 2147483647, %v2331_v17 }
 0x365   :  { %v2350_v40 = vor.u32 1.1754944e-38, %v2349_v29  ;;  %vm2348_vm6 = vcmp.eq.f32.partialorder %v2347_v30, 8.507059e+37 }
 0x369   :  { %v3567_v19 = vpop.eup %3566 }
 0x36a   :  { %v2339_v20 = vmul.f32 %v3567_v19, %v2331_v17  ;;  %v2333_v21 = vpop.xlane.xlu2 %2332  ;;  %vm2344_vm2 = vweird.f32 %v3567_v19 }
 0x36b   :  { %3568 = vrcp.f32 %v2333_v21  ;;  %vm2345_vm4 = vmor %vm2343_vm3, %vm2344_vm2  ;;  %v2364_v33 = vand.u32 2147483648, %v2333_v21  ;;  %v2362_v22 = vand.u32 2147483647, %v2333_v21  ;;  %vm2358_vm7 = vweird.f32 %v2333_v21 }
 0x36c   :  { %v2340_v23 = vsub.f32 1.0, %v2339_v20 }
 0x36d   :  { %v2365_v50 = vor.u32 1.1754944e-38, %v2364_v33  ;;  %vm2363_vm9 = vcmp.eq.f32.partialorder %v2362_v22, 8.507059e+37 }
 0x36e   :  { %v2341_v59 = vmul.f32 %v3567_v19, %v2340_v23 }
 0x370   :  { %v2342_v26 = vadd.f32 %v3567_v19, %v2341_v59 }
 0x371   :  { %v3569_v25 = vpop.eup %3568 }
 0x372   :  { %v2354_v27 = vmul.f32 %v3569_v25, %v2333_v21  ;;  %v2335_v8 = vpop.xlane.xlu0 %2334  ;;  %v2346_v38 = vsel %vm2345_vm4, %v3567_v19, %v2342_v26  ;;  %vm2359_vm5 = vweird.f32 %v3569_v25 }
 0x373   :  { %3570 = vrcp.f32 %v2335_v8  ;;  %v2351_v42 = vsel %vm2348_vm6, %v2350_v40, %v2346_v38  ;;  %vm2360_vm8 = vmor %vm2358_vm7, %vm2359_vm5  ;;  %v2379_v58 = vand.u32 2147483648, %v2335_v8  ;;  %vm2373_vm11 = vweird.f32 %v2335_v8 }
 0x374   :  { %v2355_v32 = vsub.f32 1.0, %v2354_v27  ;;  %v2352_v47 = vmul.f32 %v3559_v63, %v2351_v42  ;;  %v2377_v41 = vand.u32 2147483647, %v2335_v8 }
 0x375   :  { %v2380_v57 = vor.u32 1.1754944e-38, %v2379_v58 }
 0x376   :  { %v2356_v39 = vmul.f32 %v3569_v25, %v2355_v32  ;;  %vm2378_vm14 = vcmp.eq.f32.partialorder %v2377_v41, 8.507059e+37 }
 0x378   :  { %v2357_v10 = vadd.f32 %v3569_v25, %v2356_v39 }
 0x379   :  { %v3571_v43 = vpop.eup %3570 }
 0x37a   :  { %v2361_v37 = vsel %vm2360_vm8, %v3569_v25, %v2357_v10  ;;  %v2369_v36 = vmul.f32 %v3571_v43, %v2335_v8  ;;  %v2337_v15 = vpop.xlane.xlu1 %2336  ;;  %vm2374_vm10 = vweird.f32 %v3571_v43 }
 0x37b   :  { %v2366_v48 = vsel %vm2363_vm9, %v2365_v50, %v2361_v37  ;;  %3572 = vrcp.f32 %v2337_v15  ;;  %vm2375_vm12 = vmor %vm2373_vm11, %vm2374_vm10  ;;  %v2394_v9 = vand.u32 2147483648, %v2337_v15  ;;  %v2392_v12 = vand.u32 2147483647, %v2337_v15 }
 0x37c   :  { %v2367_v49 = vmul.f32 %v3561_v4, %v2366_v48  ;;  %v2370_v34 = vsub.f32 1.0, %v2369_v36  ;;  %vm2388_vm15 = vweird.f32 %v2337_v15 }
 0x37d   :  { %v2395_v56 = vor.u32 1.1754944e-38, %v2394_v9  ;;  %vm2393_vm1 = vcmp.eq.f32.partialorder %v2392_v12, 8.507059e+37 }
 0x37e   :  { %v3542_v51 = vpack.c.bf16 %v2367_v49, %v2352_v47  ;;  %v2371_v28 = vmul.f32 %v3571_v43, %v2370_v34 }
 0x380   :  { %3543 = vst [vmem:[%s3957_s7] sm:$0xff] %v3542_v51   ;;  %v2372_v54 = vadd.f32 %v3571_v43, %v2371_v28 }
 0x381   :  { %v3573_v53 = vpop.eup %3572 }
 0x382   :  { %v2384_v55 = vmul.f32 %v3573_v53, %v2337_v15  ;;  %v2376_v14 = vsel %vm2375_vm12, %v3571_v43, %v2372_v54  ;;  %vm2389_vm13 = vweird.f32 %v3573_v53 }
 0x383   :  { %v2381_v62 = vsel %vm2378_vm14, %v2380_v57, %v2376_v14  ;;  %vm2390_vm0 = vmor %vm2388_vm15, %vm2389_vm13 }
 0x384   :  { %v2385_v60 = vsub.f32 1.0, %v2384_v55  ;;  %v2382_v1 = vmul.f32 %v3936_v24, %v2381_v62 }
 0x386   :  { %v2386_v18 = vmul.f32 %v3573_v53, %v2385_v60 }
 0x388   :  { %v2387_v45 = vadd.f32 %v3573_v53, %v2386_v18 }
 0x38a   :  { %v2391_v0 = vsel %vm2390_vm0, %v3573_v53, %v2387_v45 }
 0x38b   :  { %v2396_v52 = vsel %vm2393_vm1, %v2395_v56, %v2391_v0 }
 0x38c   :  { %v2397_v44 = vmul.f32 %v3939_v16, %v2396_v52 }
 0x38e   :  { %v3547_v2 = vpack.c.bf16 %v2397_v44, %v2382_v1 }
 0x390   :  { %3549 = vst [vmem:[%s3957_s7 + $0x8] sm:$0xff] %v3547_v2  }
 0x391   :  { %2410 = vsyncpa [#allocation3], 1 }
 0x392   :  { %2411 = vsyncpa [#allocation5], 1 }

</bundles_post_ra>
